<compile_context>
chip_gen: v5e
topology: v5e:2x2
jax: 0.10.0
libtpu: 0.0.40
codegen_flags: <defaults>
</compile_context>

<pallas_src>
import functools

import jax
import jax.numpy as jnp
from jax.experimental import pallas as pl
from jax.experimental.pallas import tpu as pltpu


NUM_LAYERS = 4      # hidden Linear+LeakyReLU blocks
HIDDEN_DIM = 64
LATENT_SIZE = 8
BATCH = 300         # deliberately not a multiple of the batch tile
NEG_SLOPE = 0.2
FEAT_PAD = 128      # lane-dense padded feature width (>= hidden_dim, latent)


def _mlp_kernel(x_ref, w_ref, b_ref, out_ref, *, num_hidden, in_features):
    """x_ref: (TM, in_features); w_ref: (L+1, FEAT_PAD, FEAT_PAD);
    b_ref: (L+1, 1, FEAT_PAD); out_ref: (TM, FEAT_PAD)."""
    h = x_ref[...].astype(jnp.float32)                      # (TM, in_features)

    # Layer 0: Linear(in_features -> hidden) + LeakyReLU.
    w0 = w_ref[0]                                           # (FEAT_PAD, FEAT_PAD)
    h = jnp.dot(h, w0[:in_features, :],
                preferred_element_type=jnp.float32) + b_ref[0]
    h = jnp.where(h > 0, h, NEG_SLOPE * h)

    # Layers 1..num_hidden-1: Linear(hidden -> hidden) + LeakyReLU.
    for l in range(1, num_hidden):
        h = jnp.dot(h, w_ref[l], preferred_element_type=jnp.float32) + b_ref[l]
        h = jnp.where(h > 0, h, NEG_SLOPE * h)

    # Final Linear (hidden -> out), no activation. Lane-dense (TM, FEAT_PAD) store.
    out_ref[...] = (jnp.dot(h, w_ref[num_hidden],
                            preferred_element_type=jnp.float32)
                    + b_ref[num_hidden]).astype(out_ref.dtype)


def pack_params(params, feat_pad=FEAT_PAD):
    """Zero-pad per-layer (W:(in,out), b:(1,out)) into two contiguous slabs."""
    n = len(params)
    w_packed = jnp.zeros((n, feat_pad, feat_pad), jnp.float32)
    b_packed = jnp.zeros((n, 1, feat_pad), jnp.float32)
    for l, (w, b) in enumerate(params):
        din, dout = w.shape
        w_packed = w_packed.at[l, :din, :dout].set(w)
        b_packed = b_packed.at[l, :1, :dout].set(b.reshape(1, dout))
    return w_packed, b_packed


def _round_up(x, m):
    return ((x + m - 1) // m) * m


def mlp_encoder_forward(x, w_packed, b_packed, *, out_features, tm=256):
    """x: (B, in_features) f32. w_packed: (L+1, F, F). b_packed: (L+1, 1, F)."""
    batch, in_features = x.shape
    n_layers, feat_pad, _ = w_packed.shape
    num_hidden = n_layers - 1

    # Batch tile: big enough to fill the MXU, but don't over-pad tiny batches.
    tm = min(tm, _round_up(batch, 8))
    b_pad = pl.cdiv(batch, tm) * tm
    if b_pad != batch:
        x = jnp.pad(x, ((0, b_pad - batch), (0, 0)))

    kernel = functools.partial(_mlp_kernel, num_hidden=num_hidden,
                               in_features=in_features)

    out = pl.pallas_call(
        kernel,
        out_shape=jax.ShapeDtypeStruct((b_pad, feat_pad), x.dtype),
        grid=(b_pad // tm,),
        in_specs=[
            # Streamed batch tile of activations.
            pl.BlockSpec((tm, in_features), lambda i: (i, 0)),
            # Packed weights / biases: same block every step -> VMEM-resident.
            pl.BlockSpec((n_layers, feat_pad, feat_pad), lambda i: (0, 0, 0)),
            pl.BlockSpec((n_layers, 1, feat_pad), lambda i: (0, 0, 0)),
        ],
        out_specs=pl.BlockSpec((tm, feat_pad), lambda i: (i, 0)),
        compiler_params=pltpu.CompilerParams(
            dimension_semantics=("parallel",)),
    )(x, w_packed, b_packed)

    return out[:batch, :out_features]


def init_params(key, latent_size, num_layers, hidden_dim):
    """Deterministic param init mirroring nn.Linear shapes (stored as (in, out))."""
    params = []
    dims_in = [latent_size] + [hidden_dim] * (num_layers - 1)
    dims_out = [hidden_dim] * num_layers
    for din, dout in zip(dims_in, dims_out):
        key, kw, kb = jax.random.split(key, 3)
        bound = 1.0 / jnp.sqrt(din)
        w = jax.random.uniform(kw, (din, dout), jnp.float32, -bound, bound)
        b = jax.random.uniform(kb, (1, dout), jnp.float32, -bound, bound)
        params.append((w, b))
    key, kw, kb = jax.random.split(key, 3)
    bound = 1.0 / jnp.sqrt(hidden_dim)
    w = jax.random.uniform(kw, (hidden_dim, latent_size), jnp.float32, -bound, bound)
    b = jax.random.uniform(kb, (1, latent_size), jnp.float32, -bound, bound)
    params.append((w, b))
    return params


def reference_forward(x, params):
    h = x
    for (w, b) in params[:-1]:
        h = h @ w + b
        h = jnp.where(h > 0, h, NEG_SLOPE * h)
    w, b = params[-1]
    return h @ w + b


if __name__ == "__main__":
    key = jax.random.PRNGKey(0)
    kx, kp = jax.random.split(key)

    x = jax.random.normal(kx, (BATCH, LATENT_SIZE), jnp.float32)
    params = init_params(kp, LATENT_SIZE, NUM_LAYERS, HIDDEN_DIM)
    w_packed, b_packed = pack_params(params)

    out = mlp_encoder_forward(x, w_packed, b_packed, out_features=LATENT_SIZE)
    out = jax.block_until_ready(out)

    ref = reference_forward(x, params)
    assert out.shape == (BATCH, LATENT_SIZE)
    assert jnp.allclose(out, ref, atol=1e-4, rtol=1e-4), "mismatch vs reference"

    print("KERNEL_OK")
</pallas_src>

<mosaic_0001>
module attributes {stable_mosaic.version = 11 : i64} {
  func.func @_mlp_kernel(%arg0: i32, %arg1: memref<256x8xf32, #tpu.memory_space<vmem>>, %arg2: memref<5x128x128xf32, #tpu.memory_space<vmem>>, %arg3: memref<5x1x128xf32, #tpu.memory_space<vmem>>, %arg4: memref<256x128xf32, #tpu.memory_space<vmem>>) attributes {dimension_semantics = [#tpu.dimension_semantics<parallel>], iteration_bounds = array<i64: 2>, scalar_prefetch = 0 : i64, scratch_operands = 0 : i64, tpu.core_type = #tpu.core_type<tc>, window_params = [{transform_indices = @transform_0, window_bounds = array<i64: 256, 8>}, {pipeline_mode = #tpu.pipeline_mode<synchronous>, transform_indices = @transform_1, window_bounds = array<i64: 5, 128, 128>}, {pipeline_mode = #tpu.pipeline_mode<synchronous>, transform_indices = @transform_2, window_bounds = array<i64: 5, 1, 128>}, {transform_indices = @transform_3, window_bounds = array<i64: 256, 128>}]} {
    %c0 = arith.constant 0 : index
    %c0_0 = arith.constant 0 : index
    %0 = vector.load %arg1[%c0, %c0_0] : memref<256x8xf32, #tpu.memory_space<vmem>>, vector<256x8xf32>
    %c0_1 = arith.constant 0 : index
    %c0_2 = arith.constant 0 : index
    %c0_3 = arith.constant 0 : index
    %1 = vector.load %arg2[%c0_1, %c0_2, %c0_3] : memref<5x128x128xf32, #tpu.memory_space<vmem>>, vector<1x128x128xf32>
    %2 = vector.shape_cast %1 : vector<1x128x128xf32> to vector<128x128xf32>
    %3 = vector.extract_strided_slice %2 {offsets = [0, 0], sizes = [8, 128], strides = [1, 1]} : vector<128x128xf32> to vector<8x128xf32>
    %cst = arith.constant dense<0.000000e+00> : vector<256x128xf32>
    %4 = tpu.matmul %0, %3, %cst {dimension_numbers = #tpu.dot_dimension_numbers<[1], [0], [0], [1], [0, 0, 1, 1], [], []>} : vector<256x8xf32>, vector<8x128xf32>, vector<256x128xf32> -> vector<256x128xf32>
    %c0_4 = arith.constant 0 : index
    %c0_5 = arith.constant 0 : index
    %c0_6 = arith.constant 0 : index
    %5 = vector.load %arg3[%c0_4, %c0_5, %c0_6] : memref<5x1x128xf32, #tpu.memory_space<vmem>>, vector<1x1x128xf32>
    %6 = vector.shape_cast %5 : vector<1x1x128xf32> to vector<1x128xf32>
    %7 = vector.broadcast %6 : vector<1x128xf32> to vector<256x128xf32>
    %8 = arith.addf %4, %7 : vector<256x128xf32>
    %cst_7 = arith.constant 0.000000e+00 : f32
    %9 = vector.broadcast %cst_7 : f32 to vector<256x128xf32>
    %10 = arith.cmpf ogt, %8, %9 : vector<256x128xf32>
    %cst_8 = arith.constant 2.000000e-01 : f32
    %11 = vector.broadcast %cst_8 : f32 to vector<256x128xf32>
    %12 = arith.mulf %11, %8 : vector<256x128xf32>
    %13 = arith.select %10, %8, %12 : vector<256x128xi1>, vector<256x128xf32>
    %c1 = arith.constant 1 : index
    %c0_9 = arith.constant 0 : index
    %c0_10 = arith.constant 0 : index
    %14 = vector.load %arg2[%c1, %c0_9, %c0_10] : memref<5x128x128xf32, #tpu.memory_space<vmem>>, vector<1x128x128xf32>
    %15 = vector.shape_cast %14 : vector<1x128x128xf32> to vector<128x128xf32>
    %cst_11 = arith.constant dense<0.000000e+00> : vector<256x128xf32>
    %16 = tpu.matmul %13, %15, %cst_11 {dimension_numbers = #tpu.dot_dimension_numbers<[1], [0], [0], [1], [0, 0, 1, 1], [], []>} : vector<256x128xf32>, vector<128x128xf32>, vector<256x128xf32> -> vector<256x128xf32>
    %c1_12 = arith.constant 1 : index
    %c0_13 = arith.constant 0 : index
    %c0_14 = arith.constant 0 : index
    %17 = vector.load %arg3[%c1_12, %c0_13, %c0_14] : memref<5x1x128xf32, #tpu.memory_space<vmem>>, vector<1x1x128xf32>
    %18 = vector.shape_cast %17 : vector<1x1x128xf32> to vector<1x128xf32>
    %19 = vector.broadcast %18 : vector<1x128xf32> to vector<256x128xf32>
    %20 = arith.addf %16, %19 : vector<256x128xf32>
    %cst_15 = arith.constant 0.000000e+00 : f32
    %21 = vector.broadcast %cst_15 : f32 to vector<256x128xf32>
    %22 = arith.cmpf ogt, %20, %21 : vector<256x128xf32>
    %cst_16 = arith.constant 2.000000e-01 : f32
    %23 = vector.broadcast %cst_16 : f32 to vector<256x128xf32>
    %24 = arith.mulf %23, %20 : vector<256x128xf32>
    %25 = arith.select %22, %20, %24 : vector<256x128xi1>, vector<256x128xf32>
    %c2 = arith.constant 2 : index
    %c0_17 = arith.constant 0 : index
    %c0_18 = arith.constant 0 : index
    %26 = vector.load %arg2[%c2, %c0_17, %c0_18] : memref<5x128x128xf32, #tpu.memory_space<vmem>>, vector<1x128x128xf32>
    %27 = vector.shape_cast %26 : vector<1x128x128xf32> to vector<128x128xf32>
    %cst_19 = arith.constant dense<0.000000e+00> : vector<256x128xf32>
    %28 = tpu.matmul %25, %27, %cst_19 {dimension_numbers = #tpu.dot_dimension_numbers<[1], [0], [0], [1], [0, 0, 1, 1], [], []>} : vector<256x128xf32>, vector<128x128xf32>, vector<256x128xf32> -> vector<256x128xf32>
    %c2_20 = arith.constant 2 : index
    %c0_21 = arith.constant 0 : index
    %c0_22 = arith.constant 0 : index
    %29 = vector.load %arg3[%c2_20, %c0_21, %c0_22] : memref<5x1x128xf32, #tpu.memory_space<vmem>>, vector<1x1x128xf32>
    %30 = vector.shape_cast %29 : vector<1x1x128xf32> to vector<1x128xf32>
    %31 = vector.broadcast %30 : vector<1x128xf32> to vector<256x128xf32>
    %32 = arith.addf %28, %31 : vector<256x128xf32>
    %cst_23 = arith.constant 0.000000e+00 : f32
    %33 = vector.broadcast %cst_23 : f32 to vector<256x128xf32>
    %34 = arith.cmpf ogt, %32, %33 : vector<256x128xf32>
    %cst_24 = arith.constant 2.000000e-01 : f32
    %35 = vector.broadcast %cst_24 : f32 to vector<256x128xf32>
    %36 = arith.mulf %35, %32 : vector<256x128xf32>
    %37 = arith.select %34, %32, %36 : vector<256x128xi1>, vector<256x128xf32>
    %c3 = arith.constant 3 : index
    %c0_25 = arith.constant 0 : index
    %c0_26 = arith.constant 0 : index
    %38 = vector.load %arg2[%c3, %c0_25, %c0_26] : memref<5x128x128xf32, #tpu.memory_space<vmem>>, vector<1x128x128xf32>
    %39 = vector.shape_cast %38 : vector<1x128x128xf32> to vector<128x128xf32>
    %cst_27 = arith.constant dense<0.000000e+00> : vector<256x128xf32>
    %40 = tpu.matmul %37, %39, %cst_27 {dimension_numbers = #tpu.dot_dimension_numbers<[1], [0], [0], [1], [0, 0, 1, 1], [], []>} : vector<256x128xf32>, vector<128x128xf32>, vector<256x128xf32> -> vector<256x128xf32>
    %c3_28 = arith.constant 3 : index
    %c0_29 = arith.constant 0 : index
    %c0_30 = arith.constant 0 : index
    %41 = vector.load %arg3[%c3_28, %c0_29, %c0_30] : memref<5x1x128xf32, #tpu.memory_space<vmem>>, vector<1x1x128xf32>
    %42 = vector.shape_cast %41 : vector<1x1x128xf32> to vector<1x128xf32>
    %43 = vector.broadcast %42 : vector<1x128xf32> to vector<256x128xf32>
    %44 = arith.addf %40, %43 : vector<256x128xf32>
    %cst_31 = arith.constant 0.000000e+00 : f32
    %45 = vector.broadcast %cst_31 : f32 to vector<256x128xf32>
    %46 = arith.cmpf ogt, %44, %45 : vector<256x128xf32>
    %cst_32 = arith.constant 2.000000e-01 : f32
    %47 = vector.broadcast %cst_32 : f32 to vector<256x128xf32>
    %48 = arith.mulf %47, %44 : vector<256x128xf32>
    %49 = arith.select %46, %44, %48 : vector<256x128xi1>, vector<256x128xf32>
    %c4 = arith.constant 4 : index
    %c0_33 = arith.constant 0 : index
    %c0_34 = arith.constant 0 : index
    %50 = vector.load %arg2[%c4, %c0_33, %c0_34] : memref<5x128x128xf32, #tpu.memory_space<vmem>>, vector<1x128x128xf32>
    %51 = vector.shape_cast %50 : vector<1x128x128xf32> to vector<128x128xf32>
    %cst_35 = arith.constant dense<0.000000e+00> : vector<256x128xf32>
    %52 = tpu.matmul %49, %51, %cst_35 {dimension_numbers = #tpu.dot_dimension_numbers<[1], [0], [0], [1], [0, 0, 1, 1], [], []>} : vector<256x128xf32>, vector<128x128xf32>, vector<256x128xf32> -> vector<256x128xf32>
    %c4_36 = arith.constant 4 : index
    %c0_37 = arith.constant 0 : index
    %c0_38 = arith.constant 0 : index
    %53 = vector.load %arg3[%c4_36, %c0_37, %c0_38] : memref<5x1x128xf32, #tpu.memory_space<vmem>>, vector<1x1x128xf32>
    %54 = vector.shape_cast %53 : vector<1x1x128xf32> to vector<1x128xf32>
    %55 = vector.broadcast %54 : vector<1x128xf32> to vector<256x128xf32>
    %56 = arith.addf %52, %55 : vector<256x128xf32>
    %c0_39 = arith.constant 0 : index
    %c0_40 = arith.constant 0 : index
    %57 = vector.load %arg4[%c0_39, %c0_40] : memref<256x128xf32, #tpu.memory_space<vmem>>, vector<256x128xf32>
    tpu.vector_store %arg4[%c0_39, %c0_40], %56 {strides = array<i32>} : memref<256x128xf32, #tpu.memory_space<vmem>>, vector<256x128xf32>,
    return
  }
  func.func @transform_0(%arg0: i32) -> (i32, i32) {
    %c0_i32 = arith.constant 0 : i32
    %c0_i32_0 = arith.constant 0 : i32
    return %arg0, %c0_i32 : i32, i32
  }
  func.func @transform_1(%arg0: i32) -> (i32, i32, i32) {
    %c0_i32 = arith.constant 0 : i32
    %c0_i32_0 = arith.constant 0 : i32
    %c0_i32_1 = arith.constant 0 : i32
    %c0_i32_2 = arith.constant 0 : i32
    return %c0_i32, %c0_i32_0, %c0_i32_1 : i32, i32, i32
  }
  func.func @transform_2(%arg0: i32) -> (i32, i32, i32) {
    %c0_i32 = arith.constant 0 : i32
    %c0_i32_0 = arith.constant 0 : i32
    %c0_i32_1 = arith.constant 0 : i32
    %c0_i32_2 = arith.constant 0 : i32
    return %c0_i32, %c0_i32_0, %c0_i32_1 : i32, i32, i32
  }
  func.func @transform_3(%arg0: i32) -> (i32, i32) {
    %c0_i32 = arith.constant 0 : i32
    %c0_i32_0 = arith.constant 0 : i32
    return %arg0, %c0_i32 : i32, i32
  }
}

</mosaic_0001>

<bundles_post_ra>
// kernel: tpu_custom_call.1
= control target key start
LH: loop header
LB: loop body
LE: loop exit
PB: predicated region body
PF: predicated region fallthrough
CT: control target
= control target key end

     0   :  { %8 = vsyncpa [#allocation3], 0  ;;  %s2118_s0 = inlined_call_operand.vmem [shape: f32[512,8], index: 0, kind: input, shape index: {}]   ;;  %s2119_s1 = inlined_call_operand.hbm [shape: f32[5,128,128], index: 1, kind: input, shape index: {}]   ;;  %s2120_s2 = inlined_call_operand.vmem [shape: f32[5,1,128], index: 2, kind: input, shape index: {}]   ;;  %s2121_s3 = inlined_call_operand.hbm [shape: f32[512,128], index: 3, kind: output, shape index: {}]  }
   0x1   :  { %9 = vsyncpa [#allocation4], 0 }
   0x2   :  { %11 = vsyncpa [#allocation4 + $0x1], 0  ;;  %s1734_s12 = smov 0   ;;  %s1736_s13 = smov 0  }
   0x3   :  { %s1738_s14 = smov 0   ;;  %s1740_s15 = smov 0  }
   0x4 LB: > { %s1755_s16 = sadd.s32 4294967295, %s1707_s15   ;;  %s1482_s17 = sadd.s32 4294967294, %s1707_s15   ;;  %s1707_s15 = sphi %s1740_s15, %s2127_s15   ;;  %s1703_s14 = sphi %s1738_s14, %s2126_s14   ;;  %s1699_s13 = sphi %s1736_s13, %s2125_s13   ;;  %s1695_s12 = sphi %s1734_s12, %s2124_s12  }
   0x5   : > { %s1759_s18 = sadd.s32 1, %s1707_s15   ;;  %s92_s19 = sadd.s32 1, %s1703_s14 }
   0x6   : > { %s89_s20 = ssub.s32 %s1707_s15, %s1759_s18  ;;  %p102_p0 = scmp.ne.s32.totalorder %s1703_s14, %s1699_s13 }
   0x7   : > { %p90_p1 = scmp.eq.s32.totalorder %s89_s20, 0  ;;  %p103_p2 = scmp.eq.s32.totalorder %s1755_s16, 1 }
   0x8   : > { %p108_p3 = scmp.ne.s32.totalorder %s1699_s13, %s1695_s12  ;;  %p109_p4 = scmp.eq.s32.totalorder %s1482_s17, 1 }
   0x9   : > { %s1770_s21 = scalar_select %p90_p1, %s1703_s14, %s92_s19  }
   0xa   : > { %p1772_p5 = por %p103_p2, %p102_p0  ;;  %p1776_p6 = por %p109_p4, %p108_p3 }
   0xb   : > { %p1483_p7 = scmp.ge.s32.totalorder %s1707_s15, 1  ;;  %p116_p8 = scmp.lt.s32.totalorder %s1707_s15, 3 }
   0xc   : > { %p1566_p9 = scmp.eq.s32.totalorder %s1755_s16, 0  ;;  %s127_s26 = sshll.u32 %s2119_s1, 4  ;;  %s128_s26 = int_to_ptr.hbm [resolvable:$true] %s127_s26 }
   0xd   : > { %p117_p10 = pnand %p1483_p7, %p116_p8  ;;  %s1709_s27 = smov [#allocation2]  }
   0xe   : > { %s129_s28 = sshll.u32 %s1709_s27, 4  ;;  %s1710_s29 = smov 128   ;;  %s130_s28 = int_to_ptr.vmem [resolvable:$true] %s129_s28 }
   0xf   : > { %p1558_p11 = pneg %p117_p10  ;;  %s1711_s30 = smov 8  }
  0x10   : > { %157 = sbr.rel (%p117_p10) target bundleno = 951 (0x3b7), region = 32 }
  0x11   : > { %p1559_p12 = pnand %p1566_p9, %p1558_p11 }
  0x13   : > { %1561 = dma.hbm_to_vmem [thread:$0]  (!%p1559_p12), %s128_s26, 10240, %s130_s28, [#allocation3], %s1710_s29, %s1710_s29, %s1711_s30  }
  0x15   : > { %1686 = dma.done.wait (%p1566_p9), [#allocation3], 10240  }
  0x16   : > { %1688 = vsyncadd (%p1566_p9), [#allocation3], 4294957056  ;;  %s1489_s4 = sshll.u32 %s1755_s16, 5  ;;  %vm226_vm0 = vcmask 64512   ;;  %v221_v0 = vld [vmem:[#allocation2] sm:$0xff]  ;;  %v548_v6 = vld [vmem:[#allocation2 + $0xf8] sm:$0xff] }
  0x17   : > { %p183_p13 = scmp.lt.s32.totalorder %s1489_s4, 63  ;;  %338 = vmatpush.msra.mxu0 %v221_v0  ;;  %1533 = vmatpush.msra.mxu1 %v221_v0  ;;  %v547_v8 = vld [vmem:[#allocation2 + $0xf0] sm:$0xff]  ;;  %v546_v10 = vld [vmem:[#allocation2 + $0xe8] sm:$0xff]  ;;  %v545_v13 = vld [vmem:[#allocation2 + $0xe0] sm:$0xff]  ;;  %s179_s26 = sand.u32 1, %s1699_s13  }
  0x18   : > { %1534 = vmatpush.msra.mxu2 %v221_v0  ;;  %1535 = vmatpush.msra.mxu3 %v221_v0  ;;  %v544_v14 = vld [vmem:[#allocation2 + $0xd8] sm:$0xff]  ;;  %v543_v15 = vld [vmem:[#allocation2 + $0xd0] sm:$0xff]  ;;  %v542_v16 = vld [vmem:[#allocation2 + $0xc8] sm:$0xff]  ;;  %s1488_s27 = sshll.u32 %s179_s26, 8  ;;  %s1393_s10 = scalar_lea.sflag [#allocation4], %s179_s26 }
  0x19   : > { %s2129_s4 = smov (!%p183_p13, %s1489_s4), 63  ;;  %554 = vmatpush.msrb.mxu1 %v548_v6  ;;  %v541_v18 = vld [vmem:[#allocation2 + $0xc0] sm:$0xff]  ;;  %v540_v20 = vld [vmem:[#allocation2 + $0xb8] sm:$0xff]  ;;  %v539_v21 = vld [vmem:[#allocation2 + $0xb0] sm:$0xff]  ;;  %s2004_s30 = scalar_lea.vmem [#allocation5], %s1488_s27 }
  0x1a   : > { %s1490_s5 = sshll.u32 %s2129_s4, 3  ;;  %v538_v22 = vld [vmem:[#allocation2 + $0xa8] sm:$0xff]  ;;  %v537_v24 = vld [vmem:[#allocation2 + $0xa0] sm:$0xff]  ;;  %v536_v26 = vld [vmem:[#allocation2 + $0x98] sm:$0xff]  ;;  %s1532_s4 = sshll.u32 %s1755_s16, 8 }
  0x1b   : > { %s1796_s8 = scalar_lea.vmem %s2118_s0, %s1490_s5  ;;  %555 = vmatpush.msrb.mxu1 %v547_v8  ;;  %v535_v27 = vld [vmem:[#allocation2 + $0x90] sm:$0xff]  ;;  %v534_v28 = vld [vmem:[#allocation2 + $0x88] sm:$0xff]  ;;  %v533_v35 = vld [vmem:[#allocation2 + $0x80] sm:$0xff]  ;;  %s1404_s7 = scalar_lea.hbm %s2121_s3, %s1532_s4 }
  0x1c   : > { %v189_v1 = vld [vmem:[%s1796_s8] sm:$0xff]  ;;  %v190_v2 = vld [vmem:[%s1796_s8 + $0x8] sm:$0xff]  ;;  %v191_v3 = vld [vmem:[%s1796_s8 + $0x10] sm:$0xff]  ;;  %s1407_s9 = sshll.u32 %s1404_s7, 4  ;;  %s1661_s20 = scalar_lea.hbm %s2121_s3, 512  ;;  %s1408_s9 = int_to_ptr.hbm [resolvable:$true] %s1407_s9 }
  0x1d   : > { %1491 = vmatmul.msk.f32.vlgmr.msra.gmra.mxu0 %vm226_vm0, %v189_v1  ;;  %v192_v4 = vld [vmem:[%s1796_s8 + $0x18] sm:$0xff]  ;;  %v199_v5 = vld [vmem:[%s1796_s8 + $0x50] sm:$0xff]  ;;  %v193_v7 = vld [vmem:[%s1796_s8 + $0x20] sm:$0xff]  ;;  %556 = vmatpush.msrb.mxu1 %v546_v10  ;;  %s1655_s16 = sshra.s32 %s1408_s9, 4  ;;  %s1656_s16 = int_to_ptr.hbm [resolvable:$true] %s1655_s16 }
  0x1e   : > { %1501 = vmatmul.msk.f32.vlgmr.msra.gmra.mxu1 %vm226_vm0, %v199_v5  ;;  %v200_v9 = vld [vmem:[%s1796_s8 + $0x58] sm:$0xff]  ;;  %v194_v11 = vld [vmem:[%s1796_s8 + $0x28] sm:$0xff]  ;;  %v201_v12 = vld [vmem:[%s1796_s8 + $0x60] sm:$0xff]  ;;  %s1657_s11 = scalar_lea.hbm %s1656_s16, 256  ;;  %p1662_p3 = scmp.lt.s32.totalorder %s1656_s16, %s2121_s3 }
  0x1f   : > { %557 = vmatpush.msrb.mxu1 %v545_v13  ;;  %v195_v17 = vld [vmem:[%s1796_s8 + $0x30] sm:$0xff]  ;;  %v202_v19 = vld [vmem:[%s1796_s8 + $0x68] sm:$0xff]  ;;  %v196_v23 = vld [vmem:[%s1796_s8 + $0x38] sm:$0xff]  ;;  %p1658_p0 = scmp.ne.s32.totalorder %s1656_s16, %s1657_s11  ;;  %p1663_p4 = scmp.lt.s32.totalorder %s1661_s20, %s1657_s11 }
  0x20   : > { %v203_v25 = vld [vmem:[%s1796_s8 + $0x70] sm:$0xff]  ;;  %v197_v29 = vld [vmem:[%s1796_s8 + $0x40] sm:$0xff]  ;;  %v204_v30 = vld [vmem:[%s1796_s8 + $0x78] sm:$0xff] }
  0x21   : > { %558 = vmatpush.msrb.mxu1 %v544_v14  ;;  %v198_v31 = vld [vmem:[%s1796_s8 + $0x48] sm:$0xff]  ;;  %v205_v32 = vld [vmem:[%s1796_s8 + $0x80] sm:$0xff]  ;;  %v207_v34 = vld [vmem:[%s1796_s8 + $0x90] sm:$0xff]  ;;  %p1659_p1 = pnand %p1658_p0, %p1772_p5  ;;  %p1664_p7 = por %p1663_p4, %p1662_p3 }
  0x22   : > { %v206_v33 = vld [vmem:[%s1796_s8 + $0x88] sm:$0xff]  ;;  %v208_v36 = vld [vmem:[%s1796_s8 + $0x98] sm:$0xff]  ;;  %v209_v37 = vld [vmem:[%s1796_s8 + $0xa0] sm:$0xff] }
  0x23   : > { %559 = vmatpush.msrb.mxu1 %v543_v15  ;;  %1510 = vmatmul.msk.f32.vlgmr.msra.gmra.mxu2 %vm226_vm0, %v208_v36  ;;  %v1843_v38 = vld [vmem:[%s2120_s2] ss:$0 sm:$0xff]  ;;  %v210_v41 = vld [vmem:[%s1796_s8 + $0xa8] sm:$0xff]  ;;  %v211_v46 = vld [vmem:[%s1796_s8 + $0xb0] sm:$0xff]  ;;  %p1660_p2 = pneg %p1659_p1 }
  0x24   : > { %v212_v51 = vld [vmem:[%s1796_s8 + $0xb8] sm:$0xff]  ;;  %v213_v56 = vld [vmem:[%s1796_s8 + $0xc0] sm:$0xff]  ;;  %v214_v61 = vld [vmem:[%s1796_s8 + $0xc8] sm:$0xff] }
  0x25   : > { %1492 = vmatmul.msk.f32.gmra.mxu0 %vm226_vm0, %v190_v2  ;;  %560 = vmatpush.msrb.mxu1 %v542_v16  ;;  %v779_v2 = vld [vmem:[#allocation2 + $0x178] sm:$0xff]  ;;  %v777_v8 = vld [vmem:[#allocation2 + $0x168] sm:$0xff]  ;;  %v776_v10 = vld [vmem:[#allocation2 + $0x160] sm:$0xff]  ;;  %p1665_p8 = pnand %p1664_p7, %p1660_p2 }
  0x26   : > { %1502 = vmatmul.msk.f32.gmra.mxu1 %vm226_vm0, %v200_v9  ;;  %785 = vmatpush.msrb.mxu2 %v779_v2  ;;  %v216_v9 = vld [vmem:[%s1796_s8 + $0xd8] sm:$0xff] }
  0x27   : > { %561 = vmatpush.msrb.mxu1 %v541_v18  ;;  %1518 = vmatmul.msk.f32.vlgmr.msra.gmra.mxu3 %vm226_vm0, %v216_v9  ;;  %v775_v16 = vld [vmem:[#allocation2 + $0x158] sm:$0xff]  ;;  %v774_v18 = vld [vmem:[#allocation2 + $0x150] sm:$0xff] }
  0x29   : > { %562 = vmatpush.msrb.mxu1 %v540_v20 }
  0x2b   : > { %563 = vmatpush.msrb.mxu1 %v539_v21  ;;  %1511 = vmatmul.msk.f32.gmra.mxu2 %vm226_vm0, %v209_v37 }
  0x2d   : > { %1493 = vmatmul.msk.f32.gmra.mxu0 %vm226_vm0, %v191_v3  ;;  %564 = vmatpush.msrb.mxu1 %v538_v22  ;;  %v215_v3 = vld [vmem:[%s1796_s8 + $0xd0] sm:$0xff] }
  0x2e   : > { %1503 = vmatmul.msk.f32.gmra.mxu1 %vm226_vm0, %v201_v12 }
  0x2f   : > { %565 = vmatpush.msrb.mxu1 %v537_v24  ;;  %v218_v24 = vld [vmem:[%s1796_s8 + $0xe8] sm:$0xff] }
  0x31   : > { %566 = vmatpush.msrb.mxu1 %v536_v26 }
  0x33   : > { %567 = vmatpush.msrb.mxu1 %v535_v27  ;;  %1512 = vmatmul.msk.f32.gmra.mxu2 %vm226_vm0, %v210_v41  ;;  %v769_v41 = vld [vmem:[#allocation2 + $0x128] sm:$0xff] }
  0x35   : > { %1494 = vmatmul.msk.f32.gmra.mxu0 %vm226_vm0, %v192_v4  ;;  %568 = vmatpush.msrb.mxu1 %v534_v28  ;;  %v778_v4 = vld [vmem:[#allocation2 + $0x170] sm:$0xff] }
  0x36   : > { %1504 = vmatmul.msk.f32.gmra.mxu1 %vm226_vm0, %v202_v19  ;;  %786 = vmatpush.msrb.mxu2 %v778_v4 }
  0x37   : > { %569 = vmatpush.msrb.mxu1 %v533_v35 }
  0x38   : > { %787 = vmatpush.msrb.mxu2 %v777_v8 }
  0x3a   : > { %788 = vmatpush.msrb.mxu2 %v776_v10 }
  0x3b   : > { %1513 = vmatmul.msk.f32.gmra.mxu2 %vm226_vm0, %v211_v46 }
  0x3c   : > { %789 = vmatpush.msrb.mxu2 %v775_v16 }
  0x3d   : > { %1495 = vmatmul.msk.f32.gmra.mxu0 %vm226_vm0, %v193_v7 }
  0x3e   : > { %1505 = vmatmul.msk.f32.gmra.mxu1 %vm226_vm0, %v203_v25  ;;  %790 = vmatpush.msrb.mxu2 %v774_v18  ;;  %v772_v25 = vld [vmem:[#allocation2 + $0x140] sm:$0xff] }
  0x43   : > { %1514 = vmatmul.msk.f32.gmra.mxu2 %vm226_vm0, %v212_v51 }
  0x45   : > { %1496 = vmatmul.msk.f32.gmra.mxu0 %vm226_vm0, %v194_v11 }
  0x46   : > { %1506 = vmatmul.msk.f32.gmra.mxu1 %vm226_vm0, %v204_v30 }
  0x4b   : > { %1515 = vmatmul.msk.f32.gmra.mxu2 %vm226_vm0, %v213_v56  ;;  %v764_v56 = vld [vmem:[#allocation2 + $0x100] sm:$0xff] }
  0x4d   : > { %1497 = vmatmul.msk.f32.gmra.mxu0 %vm226_vm0, %v195_v17  ;;  %v217_v17 = vld [vmem:[%s1796_s8 + $0xe0] sm:$0xff] }
  0x4e   : > { %1507 = vmatmul.msk.f32.gmra.mxu1 %vm226_vm0, %v205_v32  ;;  %1519 = vmatmul.msk.f32.gmra.mxu3 %vm226_vm0, %v217_v17  ;;  %v219_v32 = vld [vmem:[%s1796_s8 + $0xf0] sm:$0xff] }
  0x53   : > { %1516 = vmatmul.msk.f32.gmra.mxu2 %vm226_vm0, %v214_v61 }
  0x55   : > { %1498 = vmatmul.msk.f32.gmra.mxu0 %vm226_vm0, %v196_v23  ;;  %v773_v23 = vld [vmem:[#allocation2 + $0x148] sm:$0xff] }
  0x56   : > { %1508 = vmatmul.msk.f32.gmra.mxu1 %vm226_vm0, %v206_v33  ;;  %791 = vmatpush.msrb.mxu2 %v773_v23  ;;  %v770_v33 = vld [vmem:[#allocation2 + $0x130] sm:$0xff] }
  0x57   : > { %1520 = vmatmul.msk.f32.gmra.mxu3 %vm226_vm0, %v218_v24 }
  0x58   : > { %792 = vmatpush.msrb.mxu2 %v772_v25 }
  0x5b   : > { %1517 = vmatmul.msk.f32.gmra.mxu2 %vm226_vm0, %v215_v3 }
  0x5d   : > { %1499 = vmatmul.msk.f32.gmra.mxu0 %vm226_vm0, %v197_v29 }
  0x5e   : > { %1509 = vmatmul.msk.f32.gmra.mxu1 %vm226_vm0, %v207_v34 }
  0x5f   : > { %1521 = vmatmul.msk.f32.gmra.mxu3 %vm226_vm0, %v219_v32 }
  0x65   : > { %1500 = vmatmul.msk.f32.gmra.mxu0 %vm226_vm0, %v198_v31  ;;  %v771_v31 = vld [vmem:[#allocation2 + $0x138] sm:$0xff] }
  0x66   : > { %793 = vmatpush.msrb.mxu2 %v771_v31 }
  0x68   : > { %794 = vmatpush.msrb.mxu2 %v770_v33 }
  0x6a   : > { %795 = vmatpush.msrb.mxu2 %v769_v41 }
  0x9a   : > { %v340_v39 = vpop.f32.mrf.mxu0 }
  0x9b   : > { %v341_v40 = vadd.f32 %v1843_v38, %v340_v39  ;;  %v370_v6 = vpop.f32.mrf.mxu1 }
  0x9c   : > { %v371_v39 = vadd.f32 %v1843_v38, %v370_v6 }
  0x9d   : > { %vm436_vm1 = vcmp.gt.f32.partialorder %v341_v40, 0.0  ;;  %v468_v42 = vmul.f32 0.2, %v341_v40 }
  0x9e   : > { %vm446_vm11 = vcmp.gt.f32.partialorder %v371_v39, 0.0 }
  0x9f   : > { %v500_v43 = vsel %vm436_vm1, %v341_v40, %v468_v42  ;;  %v220_v42 = vld [vmem:[%s1796_s8 + $0xf8] sm:$0xff]  ;;  %s1405_s8 = sshll.u32 %s2004_s30, 4  ;;  %s1406_s8 = int_to_ptr.vmem [resolvable:$true] %s1405_s8 }
  0xa0   : > { %570 = vmatmul.f32.vlgmr.msrb.gmra.mxu1 %v500_v43  ;;  %v768_v43 = vld [vmem:[#allocation2 + $0x120] sm:$0xff]  ;;  %1522 = vmatmul.msk.f32.gmra.mxu3 %vm226_vm0, %v220_v42 }
  0xa1   : > { %796 = vmatpush.msrb.mxu2 %v768_v43 }
  0xa2   : > { %v343_v44 = vpop.f32.mrf.mxu0 }
  0xa3   : > { %v344_v45 = vadd.f32 %v1843_v38, %v343_v44  ;;  %v373_v15 = vpop.f32.mrf.mxu1  ;;  %v478_v44 = vmul.f32 0.2, %v371_v39 }
  0xa4   : > { %v374_v46 = vadd.f32 %v1843_v38, %v373_v15 }
  0xa5   : > { %vm437_vm2 = vcmp.gt.f32.partialorder %v344_v45, 0.0  ;;  %v469_v47 = vmul.f32 0.2, %v344_v45 }
  0xa6   : > { %vm447_vm12 = vcmp.gt.f32.partialorder %v374_v46, 0.0 }
  0xa7   : > { %v501_v48 = vsel %vm437_vm2, %v344_v45, %v469_v47  ;;  %v510_v47 = vsel %vm446_vm11, %v371_v39, %v478_v44 }
  0xa8   : > { %573 = vmatmul.f32.gmra.mxu1 %v501_v48  ;;  %v767_v48 = vld [vmem:[#allocation2 + $0x118] sm:$0xff] }
  0xa9   : > { %797 = vmatpush.msrb.mxu2 %v767_v48 }
  0xaa   : > { %v346_v49 = vpop.f32.mrf.mxu0 }
  0xab   : > { %v347_v50 = vadd.f32 %v1843_v38, %v346_v49  ;;  %v376_v26 = vpop.f32.mrf.mxu1  ;;  %v766_v49 = vld [vmem:[#allocation2 + $0x110] sm:$0xff] }
  0xac   : > { %798 = vmatpush.msrb.mxu2 %v766_v49  ;;  %v377_v51 = vadd.f32 %v1843_v38, %v376_v26 }
  0xad   : > { %vm438_vm3 = vcmp.gt.f32.partialorder %v347_v50, 0.0  ;;  %v470_v52 = vmul.f32 0.2, %v347_v50 }
  0xae   : > { %vm448_vm13 = vcmp.gt.f32.partialorder %v377_v51, 0.0 }
  0xaf   : > { %v502_v53 = vsel %vm438_vm3, %v347_v50, %v470_v52  ;;  %v479_v50 = vmul.f32 0.2, %v374_v46 }
  0xb0   : > { %576 = vmatmul.f32.gmra.mxu1 %v502_v53 }
  0xb1   : > { %v511_v52 = vsel %vm447_vm12, %v374_v46, %v479_v50 }
  0xb2   : > { %v349_v54 = vpop.f32.mrf.mxu0 }
  0xb3   : > { %v350_v55 = vadd.f32 %v1843_v38, %v349_v54  ;;  %v379_v36 = vpop.f32.mrf.mxu1  ;;  %v765_v54 = vld [vmem:[#allocation2 + $0x108] sm:$0xff] }
  0xb4   : > { %799 = vmatpush.msrb.mxu2 %v765_v54 }
  0xb5   : > { %vm439_vm4 = vcmp.gt.f32.partialorder %v350_v55, 0.0  ;;  %v471_v57 = vmul.f32 0.2, %v350_v55 }
  0xb6   : > { %800 = vmatpush.msrb.mxu2 %v764_v56 }
  0xb7   : > { %v503_v58 = vsel %vm439_vm4, %v350_v55, %v471_v57  ;;  %v480_v55 = vmul.f32 0.2, %v377_v51  ;;  %v380_v57 = vadd.f32 %v1843_v38, %v379_v36 }
  0xb8   : > { %579 = vmatmul.f32.gmra.mxu1 %v503_v58 }
  0xb9   : > { %v512_v58 = vsel %vm448_vm13, %v377_v51, %v480_v55  ;;  %vm449_vm14 = vcmp.gt.f32.partialorder %v380_v57, 0.0 }
  0xba   : > { %v352_v59 = vpop.f32.mrf.mxu0 }
  0xbb   : > { %v353_v60 = vadd.f32 %v1843_v38, %v352_v59  ;;  %v382_v45 = vpop.f32.mrf.mxu1 }
  0xbc   : > { %v383_v61 = vadd.f32 %v1843_v38, %v382_v45 }
  0xbd   : > { %vm440_vm5 = vcmp.gt.f32.partialorder %v353_v60, 0.0  ;;  %v472_v62 = vmul.f32 0.2, %v353_v60 }
  0xbe   : > { %vm450_vm15 = vcmp.gt.f32.partialorder %v383_v61, 0.0 }
  0xbf   : > { %v504_v63 = vsel %vm440_vm5, %v353_v60, %v472_v62  ;;  %v481_v60 = vmul.f32 0.2, %v380_v57 }
  0xc0   : > { %582 = vmatmul.f32.gmra.mxu1 %v504_v63 }
  0xc1   : > { %v513_v62 = vsel %vm449_vm14, %v380_v57, %v481_v60 }
  0xc2   : > { %v355_v0 = vpop.f32.mrf.mxu0 }
  0xc3   : > { %v356_v1 = vadd.f32 %v1843_v38, %v355_v0  ;;  %v385_v53 = vpop.f32.mrf.mxu1  ;;  %v482_v0 = vmul.f32 0.2, %v383_v61 }
  0xc5   : > { %vm441_vm6 = vcmp.gt.f32.partialorder %v356_v1, 0.0  ;;  %v473_v5 = vmul.f32 0.2, %v356_v1  ;;  %v514_v2 = vsel %vm450_vm15, %v383_v61, %v482_v0 }
  0xc7   : > { %v505_v7 = vsel %vm441_vm6, %v356_v1, %v473_v5  ;;  %v386_v1 = vadd.f32 %v1843_v38, %v385_v53 }
  0xc8   : > { %585 = vmatmul.f32.gmra.mxu1 %v505_v7  ;;  %v1887_v7 = vld [vmem:[%s2120_s2 + $0x1] ss:$0 sm:$0xff] }
  0xc9   : > { %v483_v3 = vmul.f32 0.2, %v386_v1  ;;  %vm451_vm0 = vcmp.gt.f32.partialorder %v386_v1, 0.0 }
  0xca   : > { %v358_v11 = vpop.f32.mrf.mxu0 }
  0xcb   : > { %v359_v12 = vadd.f32 %v1843_v38, %v358_v11  ;;  %v388_v59 = vpop.f32.mrf.mxu1  ;;  %v515_v6 = vsel %vm451_vm0, %v386_v1, %v483_v3  ;;  %v397_v11 = vpop.f32.mrf.mxu2 }
  0xcc   : > { %v389_v5 = vadd.f32 %v1843_v38, %v388_v59 }
  0xcd   : > { %vm442_vm7 = vcmp.gt.f32.partialorder %v359_v12, 0.0  ;;  %v474_v13 = vmul.f32 0.2, %v359_v12 }
  0xce   : > { %v484_v8 = vmul.f32 0.2, %v389_v5  ;;  %vm452_vm1 = vcmp.gt.f32.partialorder %v389_v5, 0.0 }
  0xcf   : > { %v506_v14 = vsel %vm442_vm7, %v359_v12, %v474_v13 }
  0xd0   : > { %588 = vmatmul.f32.gmra.mxu1 %v506_v14  ;;  %v516_v13 = vsel %vm452_vm1, %v389_v5, %v484_v8 }
  0xd2   : > { %v361_v19 = vpop.f32.mrf.mxu0 }
  0xd3   : > { %v362_v20 = vadd.f32 %v1843_v38, %v361_v19  ;;  %v391_v63 = vpop.f32.mrf.mxu1 }
  0xd4   : > { %v392_v12 = vadd.f32 %v1843_v38, %v391_v63 }
  0xd5   : > { %vm443_vm8 = vcmp.gt.f32.partialorder %v362_v20, 0.0  ;;  %v475_v21 = vmul.f32 0.2, %v362_v20 }
  0xd6   : > { %v485_v16 = vmul.f32 0.2, %v392_v12  ;;  %vm453_vm3 = vcmp.gt.f32.partialorder %v392_v12, 0.0 }
  0xd7   : > { %v507_v22 = vsel %vm443_vm8, %v362_v20, %v475_v21 }
  0xd8   : > { %591 = vmatmul.f32.gmra.mxu1 %v507_v22  ;;  %v517_v20 = vsel %vm453_vm3, %v392_v12, %v485_v16  ;;  %v400_v22 = vpop.f32.mrf.mxu2 }
  0xda   : > { %v364_v27 = vpop.f32.mrf.mxu0 }
  0xdb   : > { %v365_v28 = vadd.f32 %v1843_v38, %v364_v27  ;;  %v394_v4 = vpop.f32.mrf.mxu1  ;;  %v398_v27 = vadd.f32 %v1843_v38, %v397_v11 }
  0xdc   : > { %v395_v19 = vadd.f32 %v1843_v38, %v394_v4 }
  0xdd   : > { %vm444_vm9 = vcmp.gt.f32.partialorder %v365_v28, 0.0  ;;  %v476_v29 = vmul.f32 0.2, %v365_v28  ;;  %v487_v32 = vmul.f32 0.2, %v398_v27  ;;  %vm455_vm7 = vcmp.gt.f32.partialorder %v398_v27, 0.0 }
  0xde   : > { %v486_v24 = vmul.f32 0.2, %v395_v19  ;;  %vm454_vm5 = vcmp.gt.f32.partialorder %v395_v19, 0.0 }
  0xdf   : > { %v508_v30 = vsel %vm444_vm9, %v365_v28, %v476_v29  ;;  %v519_v36 = vsel %vm455_vm7, %v398_v27, %v487_v32 }
  0xe0   : > { %594 = vmatmul.f32.gmra.mxu1 %v508_v30  ;;  %v518_v28 = vsel %vm454_vm5, %v395_v19, %v486_v24  ;;  %v403_v31 = vpop.f32.mrf.mxu2  ;;  %v421_v19 = vpop.f32.mrf.mxu3 }
  0xe1   : > { %v404_v44 = vadd.f32 %v1843_v38, %v403_v31 }
  0xe2   : > { %v367_v34 = vpop.f32.mrf.mxu0 }
  0xe3   : > { %v368_v35 = vadd.f32 %v1843_v38, %v367_v34  ;;  %v489_v48 = vmul.f32 0.2, %v404_v44  ;;  %vm457_vm11 = vcmp.gt.f32.partialorder %v404_v44, 0.0 }
  0xe5   : > { %vm445_vm10 = vcmp.gt.f32.partialorder %v368_v35, 0.0  ;;  %v477_v37 = vmul.f32 0.2, %v368_v35  ;;  %v521_v53 = vsel %vm457_vm11, %v404_v44, %v489_v48  ;;  %v1003_v44 = vld [vmem:[#allocation2 + $0x1c0] sm:$0xff] }
  0xe7   : > { %v509_v40 = vsel %vm445_vm10, %v368_v35, %v477_v37  ;;  %v401_v35 = vadd.f32 %v1843_v38, %v400_v22  ;;  %v1009_v22 = vld [vmem:[#allocation2 + $0x1f0] sm:$0xff] }
  0xe8   : > { %597 = vmatmul.f32.gmra.mxu1 %v509_v40  ;;  %v406_v41 = vpop.f32.mrf.mxu2  ;;  %v424_v32 = vpop.f32.mrf.mxu3 }
  0xe9   : > { %v488_v40 = vmul.f32 0.2, %v401_v35  ;;  %vm456_vm9 = vcmp.gt.f32.partialorder %v401_v35, 0.0 }
  0xeb   : > { %v520_v45 = vsel %vm456_vm9, %v401_v35, %v488_v40 }
  0xf0   : > { %600 = vmatmul.f32.gmra.mxu1 %v510_v47  ;;  %v409_v51 = vpop.f32.mrf.mxu2  ;;  %v427_v48 = vpop.f32.mrf.mxu3 }
  0xf1   : > { %v410_v59 = vadd.f32 %v1843_v38, %v409_v51 }
  0xf3   : > { %v491_v0 = vmul.f32 0.2, %v410_v59  ;;  %vm459_vm15 = vcmp.gt.f32.partialorder %v410_v59, 0.0 }
  0xf5   : > { %v523_v4 = vsel %vm459_vm15, %v410_v59, %v491_v0  ;;  %v999_v59 = vld [vmem:[#allocation2 + $0x1a0] sm:$0xff] }
  0xf8   : > { %603 = vmatmul.f32.gmra.mxu1 %v511_v52  ;;  %v407_v52 = vadd.f32 %v1843_v38, %v406_v41  ;;  %v1004_v41 = vld [vmem:[#allocation2 + $0x1c8] sm:$0xff] }
  0xfa   : > { %v490_v56 = vmul.f32 0.2, %v407_v52  ;;  %vm458_vm13 = vcmp.gt.f32.partialorder %v407_v52, 0.0 }
  0xfc   : > { %v522_v60 = vsel %vm458_vm13, %v407_v52, %v490_v56  ;;  %v1001_v52 = vld [vmem:[#allocation2 + $0x1b0] sm:$0xff] }
 0x100   : > { %606 = vmatmul.f32.gmra.mxu1 %v512_v58 }
 0x108   : > { %609 = vmatmul.f32.gmra.mxu1 %v513_v62  ;;  %v412_v62 = vpop.f32.mrf.mxu2 }
 0x109   : > { %v413_v3 = vadd.f32 %v1843_v38, %v412_v62  ;;  %v998_v62 = vld [vmem:[#allocation2 + $0x198] sm:$0xff] }
 0x10b   : > { %vm460_vm1 = vcmp.gt.f32.partialorder %v413_v3, 0.0 }
 0x110   : > { %612 = vmatmul.f32.gmra.mxu1 %v514_v2  ;;  %v415_v8 = vpop.f32.mrf.mxu2 }
 0x111   : > { %v416_v12 = vadd.f32 %v1843_v38, %v415_v8  ;;  %v995_v8 = vld [vmem:[#allocation2 + $0x180] sm:$0xff] }
 0x113   : > { %v493_v16 = vmul.f32 0.2, %v416_v12  ;;  %vm461_vm3 = vcmp.gt.f32.partialorder %v416_v12, 0.0 }
 0x115   : > { %v525_v24 = vsel %vm461_vm3, %v416_v12, %v493_v16 }
 0x118   : > { %615 = vmatmul.f32.gmra.mxu1 %v515_v6 }
 0x11d   : > { %v571_v9 = vpop.f32.mrf.mxu1 }
 0x11e   : > { %v572_v10 = vadd.f32 %v1887_v7, %v571_v9  ;;  %v492_v9 = vmul.f32 0.2, %v413_v3 }
 0x120   : > { %618 = vmatmul.f32.gmra.mxu1 %v516_v13  ;;  %vm667_vm2 = vcmp.gt.f32.partialorder %v572_v10, 0.0  ;;  %v699_v14 = vmul.f32 0.2, %v572_v10  ;;  %v524_v13 = vsel %vm460_vm1, %v413_v3, %v492_v9 }
 0x122   : > { %v731_v15 = vsel %vm667_vm2, %v572_v10, %v699_v14 }
 0x123   : > { %801 = vmatmul.f32.vlgmr.msrb.gmra.mxu2 %v731_v15 }
 0x125   : > { %v574_v17 = vpop.f32.mrf.mxu1 }
 0x126   : > { %v575_v18 = vadd.f32 %v1887_v7, %v574_v17  ;;  %v1010_v17 = vld [vmem:[#allocation2 + $0x1f8] sm:$0xff] }
 0x127   : > { %1016 = vmatpush.msrb.mxu3 %v1010_v17 }
 0x128   : > { %621 = vmatmul.f32.gmra.mxu1 %v517_v20  ;;  %vm668_vm4 = vcmp.gt.f32.partialorder %v575_v18, 0.0  ;;  %v700_v21 = vmul.f32 0.2, %v575_v18 }
 0x129   : > { %1017 = vmatpush.msrb.mxu3 %v1009_v22 }
 0x12a   : > { %v732_v23 = vsel %vm668_vm4, %v575_v18, %v700_v21  ;;  %v418_v18 = vpop.f32.mrf.mxu2 }
 0x12b   : > { %804 = vmatmul.f32.gmra.mxu2 %v732_v23  ;;  %v419_v23 = vadd.f32 %v1843_v38, %v418_v18 }
 0x12d   : > { %v577_v25 = vpop.f32.mrf.mxu1  ;;  %vm462_vm5 = vcmp.gt.f32.partialorder %v419_v23, 0.0 }
 0x12e   : > { %v578_v26 = vadd.f32 %v1887_v7, %v577_v25 }
 0x130   : > { %624 = vmatmul.f32.gmra.mxu1 %v518_v28  ;;  %vm669_vm6 = vcmp.gt.f32.partialorder %v578_v26, 0.0  ;;  %v701_v29 = vmul.f32 0.2, %v578_v26  ;;  %v494_v28 = vmul.f32 0.2, %v419_v23 }
 0x132   : > { %v733_v30 = vsel %vm669_vm6, %v578_v26, %v701_v29  ;;  %v1008_v26 = vld [vmem:[#allocation2 + $0x1e8] sm:$0xff]  ;;  %v1007_v29 = vld [vmem:[#allocation2 + $0x1e0] sm:$0xff]  ;;  %v526_v35 = vsel %vm462_vm5, %v419_v23, %v494_v28 }
 0x133   : > { %807 = vmatmul.f32.gmra.mxu2 %v733_v30  ;;  %1018 = vmatpush.msrb.mxu3 %v1008_v26 }
 0x135   : > { %v580_v33 = vpop.f32.mrf.mxu1  ;;  %1019 = vmatpush.msrb.mxu3 %v1007_v29 }
 0x136   : > { %v581_v34 = vadd.f32 %v1887_v7, %v580_v33  ;;  %v1006_v33 = vld [vmem:[#allocation2 + $0x1d8] sm:$0xff] }
 0x137   : > { %1020 = vmatpush.msrb.mxu3 %v1006_v33 }
 0x138   : > { %627 = vmatmul.f32.gmra.mxu1 %v519_v36  ;;  %vm670_vm8 = vcmp.gt.f32.partialorder %v581_v34, 0.0  ;;  %v702_v37 = vmul.f32 0.2, %v581_v34 }
 0x13a   : > { %v734_v39 = vsel %vm670_vm8, %v581_v34, %v702_v37  ;;  %v422_v34 = vadd.f32 %v1843_v38, %v421_v19  ;;  %v1005_v37 = vld [vmem:[#allocation2 + $0x1d0] sm:$0xff] }
 0x13b   : > { %810 = vmatmul.f32.gmra.mxu2 %v734_v39  ;;  %1021 = vmatpush.msrb.mxu3 %v1005_v37 }
 0x13c   : > { %v495_v40 = vmul.f32 0.2, %v422_v34  ;;  %vm463_vm7 = vcmp.gt.f32.partialorder %v422_v34, 0.0 }
 0x13d   : > { %v583_v42 = vpop.f32.mrf.mxu1  ;;  %1022 = vmatpush.msrb.mxu3 %v1004_v41 }
 0x13e   : > { %v584_v43 = vadd.f32 %v1887_v7, %v583_v42 }
 0x13f   : > { %1023 = vmatpush.msrb.mxu3 %v1003_v44 }
 0x140   : > { %630 = vmatmul.f32.gmra.mxu1 %v520_v45  ;;  %vm671_vm10 = vcmp.gt.f32.partialorder %v584_v43, 0.0  ;;  %v703_v46 = vmul.f32 0.2, %v584_v43  ;;  %v425_v45 = vadd.f32 %v1843_v38, %v424_v32 }
 0x142   : > { %v735_v47 = vsel %vm671_vm10, %v584_v43, %v703_v46  ;;  %v527_v46 = vsel %vm463_vm7, %v422_v34, %v495_v40  ;;  %v496_v51 = vmul.f32 0.2, %v425_v45  ;;  %vm464_vm9 = vcmp.gt.f32.partialorder %v425_v45, 0.0 }
 0x143   : > { %813 = vmatmul.f32.gmra.mxu2 %v735_v47 }
 0x144   : > { %v528_v56 = vsel %vm464_vm9, %v425_v45, %v496_v51 }
 0x145   : > { %v586_v49 = vpop.f32.mrf.mxu1 }
 0x146   : > { %v587_v50 = vadd.f32 %v1887_v7, %v586_v49  ;;  %v1002_v49 = vld [vmem:[#allocation2 + $0x1b8] sm:$0xff] }
 0x147   : > { %1024 = vmatpush.msrb.mxu3 %v1002_v49 }
 0x148   : > { %633 = vmatmul.f32.gmra.mxu1 %v521_v53  ;;  %vm672_vm12 = vcmp.gt.f32.partialorder %v587_v50, 0.0  ;;  %v704_v54 = vmul.f32 0.2, %v587_v50 }
 0x149   : > { %1025 = vmatpush.msrb.mxu3 %v1001_v52 }
 0x14a   : > { %v736_v55 = vsel %vm672_vm12, %v587_v50, %v704_v54 }
 0x14b   : > { %816 = vmatmul.f32.gmra.mxu2 %v736_v55  ;;  %v428_v55 = vadd.f32 %v1843_v38, %v427_v48 }
 0x14d   : > { %v589_v57 = vpop.f32.mrf.mxu1  ;;  %vm465_vm11 = vcmp.gt.f32.partialorder %v428_v55, 0.0 }
 0x14e   : > { %v590_v58 = vadd.f32 %v1887_v7, %v589_v57 }
 0x150   : > { %636 = vmatmul.f32.gmra.mxu1 %v522_v60  ;;  %vm673_vm14 = vcmp.gt.f32.partialorder %v590_v58, 0.0  ;;  %v705_v61 = vmul.f32 0.2, %v590_v58 }
 0x152   : > { %v737_v63 = vsel %vm673_vm14, %v590_v58, %v705_v61  ;;  %v1000_v58 = vld [vmem:[#allocation2 + $0x1a8] sm:$0xff]  ;;  %v430_v61 = vpop.f32.mrf.mxu3 }
 0x153   : > { %819 = vmatmul.f32.gmra.mxu2 %v737_v63  ;;  %1026 = vmatpush.msrb.mxu3 %v1000_v58  ;;  %v497_v63 = vmul.f32 0.2, %v428_v55  ;;  %v431_v3 = vadd.f32 %v1843_v38, %v430_v61 }
 0x155   : > { %v592_v1 = vpop.f32.mrf.mxu1  ;;  %1027 = vmatpush.msrb.mxu3 %v999_v59  ;;  %vm466_vm13 = vcmp.gt.f32.partialorder %v431_v3, 0.0 }
 0x156   : > { %v593_v2 = vadd.f32 %v1887_v7, %v592_v1 }
 0x157   : > { %1028 = vmatpush.msrb.mxu3 %v998_v62 }
 0x158   : > { %639 = vmatmul.f32.gmra.mxu1 %v523_v4  ;;  %vm674_vm0 = vcmp.gt.f32.partialorder %v593_v2, 0.0  ;;  %v706_v5 = vmul.f32 0.2, %v593_v2  ;;  %v529_v4 = vsel %vm465_vm11, %v428_v55, %v497_v63 }
 0x15a   : > { %v738_v6 = vsel %vm674_vm0, %v593_v2, %v706_v5  ;;  %v997_v2 = vld [vmem:[#allocation2 + $0x190] sm:$0xff] }
 0x15b   : > { %822 = vmatmul.f32.gmra.mxu2 %v738_v6  ;;  %1029 = vmatpush.msrb.mxu3 %v997_v2  ;;  %v996_v6 = vld [vmem:[#allocation2 + $0x188] sm:$0xff] }
 0x15d   : > { %v595_v10 = vpop.f32.mrf.mxu1  ;;  %1030 = vmatpush.msrb.mxu3 %v996_v6 }
 0x15e   : > { %v596_v11 = vadd.f32 %v1887_v7, %v595_v10  ;;  %v498_v10 = vmul.f32 0.2, %v431_v3 }
 0x15f   : > { %1031 = vmatpush.msrb.mxu3 %v995_v8 }
 0x160   : > { %642 = vmatmul.f32.gmra.mxu1 %v524_v13  ;;  %vm675_vm2 = vcmp.gt.f32.partialorder %v596_v11, 0.0  ;;  %v707_v14 = vmul.f32 0.2, %v596_v11 }
 0x162   : > { %v739_v15 = vsel %vm675_vm2, %v596_v11, %v707_v14  ;;  %v433_v11 = vpop.f32.mrf.mxu3 }
 0x163   : > { %825 = vmatmul.f32.gmra.mxu2 %v739_v15  ;;  %v434_v14 = vadd.f32 %v1843_v38, %v433_v11  ;;  %v530_v15 = vsel %vm466_vm13, %v431_v3, %v498_v10 }
 0x165   : > { %v598_v20 = vpop.f32.mrf.mxu1  ;;  %v499_v18 = vmul.f32 0.2, %v434_v14  ;;  %vm467_vm15 = vcmp.gt.f32.partialorder %v434_v14, 0.0 }
 0x166   : > { %v599_v21 = vadd.f32 %v1887_v7, %v598_v20 }
 0x168   : > { %645 = vmatmul.f32.gmra.mxu1 %v525_v24  ;;  %vm676_vm4 = vcmp.gt.f32.partialorder %v599_v21, 0.0  ;;  %v708_v25 = vmul.f32 0.2, %v599_v21 }
 0x16a   : > { %v740_v27 = vsel %vm676_vm4, %v599_v21, %v708_v25  ;;  %v531_v21 = vsel %vm467_vm15, %v434_v14, %v499_v18 }
 0x16b   : > { %828 = vmatmul.f32.gmra.mxu2 %v740_v27  ;;  %v1924_v27 = vld [vmem:[%s2120_s2 + $0x2] ss:$0 sm:$0xff] }
 0x16d   : > { %v601_v30 = vpop.f32.mrf.mxu1 }
 0x16e   : > { %v602_v31 = vadd.f32 %v1887_v7, %v601_v30 }
 0x170   : > { %648 = vmatmul.f32.gmra.mxu1 %v526_v35  ;;  %vm677_vm6 = vcmp.gt.f32.partialorder %v602_v31, 0.0  ;;  %v709_v36 = vmul.f32 0.2, %v602_v31 }
 0x172   : > { %v741_v39 = vsel %vm677_vm6, %v602_v31, %v709_v36 }
 0x173   : > { %831 = vmatmul.f32.gmra.mxu2 %v741_v39 }
 0x175   : > { %v604_v42 = vpop.f32.mrf.mxu1 }
 0x176   : > { %v605_v43 = vadd.f32 %v1887_v7, %v604_v42 }
 0x178   : > { %651 = vmatmul.f32.gmra.mxu1 %v527_v46  ;;  %vm678_vm8 = vcmp.gt.f32.partialorder %v605_v43, 0.0  ;;  %v710_v47 = vmul.f32 0.2, %v605_v43 }
 0x17a   : > { %v742_v50 = vsel %vm678_vm8, %v605_v43, %v710_v47 }
 0x17b   : > { %834 = vmatmul.f32.gmra.mxu2 %v742_v50 }
 0x17d   : > { %v607_v53 = vpop.f32.mrf.mxu1 }
 0x17e   : > { %v608_v54 = vadd.f32 %v1887_v7, %v607_v53 }
 0x180   : > { %654 = vmatmul.f32.gmra.mxu1 %v528_v56  ;;  %vm679_vm10 = vcmp.gt.f32.partialorder %v608_v54, 0.0  ;;  %v711_v57 = vmul.f32 0.2, %v608_v54 }
 0x182   : > { %v743_v60 = vsel %vm679_vm10, %v608_v54, %v711_v57 }
 0x183   : > { %837 = vmatmul.f32.gmra.mxu2 %v743_v60 }
 0x185   : > { %v610_v0 = vpop.f32.mrf.mxu1 }
 0x186   : > { %v611_v1 = vadd.f32 %v1887_v7, %v610_v0 }
 0x188   : > { %657 = vmatmul.f32.gmra.mxu1 %v529_v4  ;;  %vm680_vm12 = vcmp.gt.f32.partialorder %v611_v1, 0.0  ;;  %v712_v5 = vmul.f32 0.2, %v611_v1 }
 0x18a   : > { %v744_v9 = vsel %vm680_vm12, %v611_v1, %v712_v5 }
 0x18b   : > { %840 = vmatmul.f32.gmra.mxu2 %v744_v9 }
 0x18d   : > { %v613_v12 = vpop.f32.mrf.mxu1 }
 0x18e   : > { %v614_v13 = vadd.f32 %v1887_v7, %v613_v12 }
 0x190   : > { %660 = vmatmul.f32.gmra.mxu1 %v530_v15  ;;  %vm681_vm14 = vcmp.gt.f32.partialorder %v614_v13, 0.0  ;;  %v713_v16 = vmul.f32 0.2, %v614_v13 }
 0x192   : > { %v745_v17 = vsel %vm681_vm14, %v614_v13, %v713_v16 }
 0x193   : > { %843 = vmatmul.f32.gmra.mxu2 %v745_v17 }
 0x195   : > { %v616_v19 = vpop.f32.mrf.mxu1 }
 0x196   : > { %v617_v20 = vadd.f32 %v1887_v7, %v616_v19 }
 0x198   : > { %663 = vmatmul.f32.gmra.mxu1 %v531_v21  ;;  %vm682_vm0 = vcmp.gt.f32.partialorder %v617_v20, 0.0  ;;  %v714_v22 = vmul.f32 0.2, %v617_v20 }
 0x19a   : > { %v746_v23 = vsel %vm682_vm0, %v617_v20, %v714_v22  ;;  %v1241_v22 = vld [vmem:[#allocation2 + $0x278] sm:$0xff] }
 0x19b   : > { %846 = vmatmul.f32.gmra.mxu2 %v746_v23  ;;  %1247 = vmatpush.msrb.mxu0 %v1241_v22 }
 0x19c   : > { %1536 = vmatpush.msra.mxu3 %v1241_v22 }
 0x19d   : > { %v619_v24 = vpop.f32.mrf.mxu1 }
 0x19e   : > { %v620_v38 = vadd.f32 %v1887_v7, %v619_v24 }
 0x1a0   : > { %v715_v25 = vmul.f32 0.2, %v620_v38  ;;  %vm683_vm1 = vcmp.gt.f32.partialorder %v620_v38, 0.0 }
 0x1a2   : > { %v747_v26 = vsel %vm683_vm1, %v620_v38, %v715_v25 }
 0x1a3   : > { %849 = vmatmul.f32.gmra.mxu2 %v747_v26 }
 0x1a5   : > { %v622_v28 = vpop.f32.mrf.mxu1 }
 0x1a6   : > { %v623_v29 = vadd.f32 %v1887_v7, %v622_v28  ;;  %v802_v30 = vpop.f32.mrf.mxu2  ;;  %v1240_v28 = vld [vmem:[#allocation2 + $0x270] sm:$0xff] }
 0x1a7   : > { %v803_v31 = vadd.f32 %v1924_v27, %v802_v30  ;;  %1248 = vmatpush.msrb.mxu0 %v1240_v28  ;;  %1537 = vmatpush.msra.mxu3 %v1240_v28 }
 0x1a8   : > { %v716_v32 = vmul.f32 0.2, %v623_v29  ;;  %vm684_vm2 = vcmp.gt.f32.partialorder %v623_v29, 0.0 }
 0x1a9   : > { %vm898_vm3 = vcmp.gt.f32.partialorder %v803_v31, 0.0  ;;  %v930_v33 = vmul.f32 0.2, %v803_v31 }
 0x1aa   : > { %v748_v34 = vsel %vm684_vm2, %v623_v29, %v716_v32 }
 0x1ab   : > { %852 = vmatmul.f32.gmra.mxu2 %v748_v34  ;;  %v962_v35 = vsel %vm898_vm3, %v803_v31, %v930_v33 }
 0x1ac   : > { %1032 = vmatmul.f32.vlgmr.msrb.gmra.mxu3 %v962_v35 }
 0x1ad   : > { %v625_v36 = vpop.f32.mrf.mxu1 }
 0x1ae   : > { %v626_v37 = vadd.f32 %v1887_v7, %v625_v36  ;;  %v805_v39 = vpop.f32.mrf.mxu2 }
 0x1af   : > { %v806_v40 = vadd.f32 %v1924_v27, %v805_v39  ;;  %v1238_v39 = vld [vmem:[#allocation2 + $0x260] sm:$0xff] }
 0x1b0   : > { %v717_v41 = vmul.f32 0.2, %v626_v37  ;;  %vm685_vm4 = vcmp.gt.f32.partialorder %v626_v37, 0.0 }
 0x1b1   : > { %vm899_vm5 = vcmp.gt.f32.partialorder %v806_v40, 0.0  ;;  %v931_v42 = vmul.f32 0.2, %v806_v40 }
 0x1b2   : > { %v749_v43 = vsel %vm685_vm4, %v626_v37, %v717_v41  ;;  %v1239_v37 = vld [vmem:[#allocation2 + $0x268] sm:$0xff] }
 0x1b3   : > { %855 = vmatmul.f32.gmra.mxu2 %v749_v43  ;;  %v963_v44 = vsel %vm899_vm5, %v806_v40, %v931_v42  ;;  %1249 = vmatpush.msrb.mxu0 %v1239_v37 }
 0x1b4   : > { %1035 = vmatmul.f32.gmra.mxu3 %v963_v44 }
 0x1b5   : > { %v628_v45 = vpop.f32.mrf.mxu1  ;;  %1538 = vmatpush.msra.mxu3 %v1239_v37  ;;  %1250 = vmatpush.msrb.mxu0 %v1238_v39 }
 0x1b6   : > { %v629_v46 = vadd.f32 %v1887_v7, %v628_v45  ;;  %v808_v47 = vpop.f32.mrf.mxu2 }
 0x1b7   : > { %v809_v48 = vadd.f32 %v1924_v27, %v808_v47  ;;  %1539 = vmatpush.msra.mxu3 %v1238_v39 }
 0x1b8   : > { %v718_v49 = vmul.f32 0.2, %v629_v46  ;;  %vm686_vm6 = vcmp.gt.f32.partialorder %v629_v46, 0.0 }
 0x1b9   : > { %vm900_vm7 = vcmp.gt.f32.partialorder %v809_v48, 0.0  ;;  %v932_v50 = vmul.f32 0.2, %v809_v48 }
 0x1ba   : > { %v750_v51 = vsel %vm686_vm6, %v629_v46, %v718_v49 }
 0x1bb   : > { %858 = vmatmul.f32.gmra.mxu2 %v750_v51  ;;  %v964_v52 = vsel %vm900_vm7, %v809_v48, %v932_v50  ;;  %v1237_v48 = vld [vmem:[#allocation2 + $0x258] sm:$0xff] }
 0x1bc   : > { %1038 = vmatmul.f32.gmra.mxu3 %v964_v52  ;;  %1251 = vmatpush.msrb.mxu0 %v1237_v48  ;;  %v1236_v52 = vld [vmem:[#allocation2 + $0x250] sm:$0xff] }
 0x1bd   : > { %v631_v53 = vpop.f32.mrf.mxu1  ;;  %1540 = vmatpush.msra.mxu3 %v1237_v48  ;;  %v1961_v48 = vld [vmem:[%s2120_s2 + $0x3] ss:$0 sm:$0xff] }
 0x1be   : > { %v632_v54 = vadd.f32 %v1887_v7, %v631_v53  ;;  %v811_v55 = vpop.f32.mrf.mxu2  ;;  %1252 = vmatpush.msrb.mxu0 %v1236_v52 }
 0x1bf   : > { %v812_v56 = vadd.f32 %v1924_v27, %v811_v55  ;;  %1541 = vmatpush.msra.mxu3 %v1236_v52 }
 0x1c0   : > { %v719_v57 = vmul.f32 0.2, %v632_v54  ;;  %vm687_vm8 = vcmp.gt.f32.partialorder %v632_v54, 0.0 }
 0x1c1   : > { %vm901_vm9 = vcmp.gt.f32.partialorder %v812_v56, 0.0  ;;  %v933_v58 = vmul.f32 0.2, %v812_v56 }
 0x1c2   : > { %v751_v59 = vsel %vm687_vm8, %v632_v54, %v719_v57 }
 0x1c3   : > { %861 = vmatmul.f32.gmra.mxu2 %v751_v59  ;;  %v965_v60 = vsel %vm901_vm9, %v812_v56, %v933_v58  ;;  %v1235_v58 = vld [vmem:[#allocation2 + $0x248] sm:$0xff] }
 0x1c4   : > { %1041 = vmatmul.f32.gmra.mxu3 %v965_v60  ;;  %1253 = vmatpush.msrb.mxu0 %v1235_v58 }
 0x1c5   : > { %v634_v61 = vpop.f32.mrf.mxu1  ;;  %1542 = vmatpush.msra.mxu3 %v1235_v58 }
 0x1c6   : > { %v635_v62 = vadd.f32 %v1887_v7, %v634_v61  ;;  %v814_v63 = vpop.f32.mrf.mxu2 }
 0x1c7   : > { %v815_v0 = vadd.f32 %v1924_v27, %v814_v63 }
 0x1c8   : > { %v720_v1 = vmul.f32 0.2, %v635_v62  ;;  %vm688_vm10 = vcmp.gt.f32.partialorder %v635_v62, 0.0 }
 0x1c9   : > { %vm902_vm11 = vcmp.gt.f32.partialorder %v815_v0, 0.0  ;;  %v934_v2 = vmul.f32 0.2, %v815_v0 }
 0x1ca   : > { %v752_v3 = vsel %vm688_vm10, %v635_v62, %v720_v1 }
 0x1cb   : > { %864 = vmatmul.f32.gmra.mxu2 %v752_v3  ;;  %v966_v4 = vsel %vm902_vm11, %v815_v0, %v934_v2  ;;  %v1234_v2 = vld [vmem:[#allocation2 + $0x240] sm:$0xff]  ;;  %v1233_v3 = vld [vmem:[#allocation2 + $0x238] sm:$0xff] }
 0x1cc   : > { %1044 = vmatmul.f32.gmra.mxu3 %v966_v4  ;;  %1254 = vmatpush.msrb.mxu0 %v1234_v2 }
 0x1cd   : > { %v637_v5 = vpop.f32.mrf.mxu1  ;;  %1543 = vmatpush.msra.mxu3 %v1234_v2 }
 0x1ce   : > { %v638_v6 = vadd.f32 %v1887_v7, %v637_v5  ;;  %v817_v8 = vpop.f32.mrf.mxu2  ;;  %1255 = vmatpush.msrb.mxu0 %v1233_v3 }
 0x1cf   : > { %v818_v9 = vadd.f32 %v1924_v27, %v817_v8  ;;  %1544 = vmatpush.msra.mxu3 %v1233_v3 }
 0x1d0   : > { %v721_v10 = vmul.f32 0.2, %v638_v6  ;;  %vm689_vm12 = vcmp.gt.f32.partialorder %v638_v6, 0.0 }
 0x1d1   : > { %vm903_vm13 = vcmp.gt.f32.partialorder %v818_v9, 0.0  ;;  %v935_v11 = vmul.f32 0.2, %v818_v9 }
 0x1d2   : > { %v753_v12 = vsel %vm689_vm12, %v638_v6, %v721_v10 }
 0x1d3   : > { %867 = vmatmul.f32.gmra.mxu2 %v753_v12  ;;  %v967_v13 = vsel %vm903_vm13, %v818_v9, %v935_v11 }
 0x1d4   : > { %1047 = vmatmul.f32.gmra.mxu3 %v967_v13  ;;  %v1232_v13 = vld [vmem:[#allocation2 + $0x230] sm:$0xff] }
 0x1d5   : > { %v640_v14 = vpop.f32.mrf.mxu1  ;;  %1256 = vmatpush.msrb.mxu0 %v1232_v13  ;;  %1545 = vmatpush.msra.mxu3 %v1232_v13 }
 0x1d6   : > { %v641_v15 = vadd.f32 %v1887_v7, %v640_v14  ;;  %v820_v16 = vpop.f32.mrf.mxu2  ;;  %v1231_v14 = vld [vmem:[#allocation2 + $0x228] sm:$0xff] }
 0x1d7   : > { %v821_v17 = vadd.f32 %v1924_v27, %v820_v16  ;;  %1257 = vmatpush.msrb.mxu0 %v1231_v14  ;;  %1546 = vmatpush.msra.mxu3 %v1231_v14 }
 0x1d8   : > { %v722_v18 = vmul.f32 0.2, %v641_v15  ;;  %vm690_vm14 = vcmp.gt.f32.partialorder %v641_v15, 0.0 }
 0x1d9   : > { %vm904_vm15 = vcmp.gt.f32.partialorder %v821_v17, 0.0  ;;  %v936_v19 = vmul.f32 0.2, %v821_v17 }
 0x1da   : > { %v754_v20 = vsel %vm690_vm14, %v641_v15, %v722_v18 }
 0x1db   : > { %870 = vmatmul.f32.gmra.mxu2 %v754_v20  ;;  %v968_v21 = vsel %vm904_vm15, %v821_v17, %v936_v19  ;;  %v1230_v19 = vld [vmem:[#allocation2 + $0x220] sm:$0xff] }
 0x1dc   : > { %1050 = vmatmul.f32.gmra.mxu3 %v968_v21  ;;  %1258 = vmatpush.msrb.mxu0 %v1230_v19  ;;  %v1229_v21 = vld [vmem:[#allocation2 + $0x218] sm:$0xff] }
 0x1dd   : > { %v643_v23 = vpop.f32.mrf.mxu1  ;;  %1547 = vmatpush.msra.mxu3 %v1230_v19 }
 0x1de   : > { %v644_v24 = vadd.f32 %v1887_v7, %v643_v23  ;;  %v823_v38 = vpop.f32.mrf.mxu2  ;;  %1259 = vmatpush.msrb.mxu0 %v1229_v21 }
 0x1df   : > { %v824_v25 = vadd.f32 %v1924_v27, %v823_v38  ;;  %v1228_v38 = vld [vmem:[#allocation2 + $0x210] sm:$0xff]  ;;  %1548 = vmatpush.msra.mxu3 %v1229_v21 }
 0x1e0   : > { %v723_v26 = vmul.f32 0.2, %v644_v24  ;;  %vm691_vm0 = vcmp.gt.f32.partialorder %v644_v24, 0.0  ;;  %1260 = vmatpush.msrb.mxu0 %v1228_v38 }
 0x1e1   : > { %vm905_vm1 = vcmp.gt.f32.partialorder %v824_v25, 0.0  ;;  %v937_v29 = vmul.f32 0.2, %v824_v25  ;;  %1549 = vmatpush.msra.mxu3 %v1228_v38 }
 0x1e2   : > { %v755_v30 = vsel %vm691_vm0, %v644_v24, %v723_v26  ;;  %v1227_v26 = vld [vmem:[#allocation2 + $0x208] sm:$0xff] }
 0x1e3   : > { %873 = vmatmul.f32.gmra.mxu2 %v755_v30  ;;  %v969_v31 = vsel %vm905_vm1, %v824_v25, %v937_v29  ;;  %1261 = vmatpush.msrb.mxu0 %v1227_v26 }
 0x1e4   : > { %1053 = vmatmul.f32.gmra.mxu3 %v969_v31  ;;  %v1226_v31 = vld [vmem:[#allocation2 + $0x200] sm:$0xff] }
 0x1e5   : > { %v646_v32 = vpop.f32.mrf.mxu1  ;;  %1550 = vmatpush.msra.mxu3 %v1227_v26  ;;  %1262 = vmatpush.msrb.mxu0 %v1226_v31 }
 0x1e6   : > { %v647_v33 = vadd.f32 %v1887_v7, %v646_v32  ;;  %v826_v34 = vpop.f32.mrf.mxu2 }
 0x1e7   : > { %v827_v35 = vadd.f32 %v1924_v27, %v826_v34  ;;  %1551 = vmatpush.msra.mxu3 %v1226_v31 }
 0x1e8   : > { %v724_v36 = vmul.f32 0.2, %v647_v33  ;;  %vm692_vm2 = vcmp.gt.f32.partialorder %v647_v33, 0.0 }
 0x1e9   : > { %vm906_vm3 = vcmp.gt.f32.partialorder %v827_v35, 0.0  ;;  %v938_v40 = vmul.f32 0.2, %v827_v35 }
 0x1ea   : > { %v756_v41 = vsel %vm692_vm2, %v647_v33, %v724_v36 }
 0x1eb   : > { %876 = vmatmul.f32.gmra.mxu2 %v756_v41  ;;  %v970_v42 = vsel %vm906_vm3, %v827_v35, %v938_v40 }
 0x1ec   : > { %1056 = vmatmul.f32.gmra.mxu3 %v970_v42 }
 0x1ed   : > { %v649_v43 = vpop.f32.mrf.mxu1 }
 0x1ee   : > { %v650_v44 = vadd.f32 %v1887_v7, %v649_v43  ;;  %v829_v45 = vpop.f32.mrf.mxu2 }
 0x1ef   : > { %v830_v46 = vadd.f32 %v1924_v27, %v829_v45 }
 0x1f0   : > { %v725_v47 = vmul.f32 0.2, %v650_v44  ;;  %vm693_vm4 = vcmp.gt.f32.partialorder %v650_v44, 0.0 }
 0x1f1   : > { %vm907_vm5 = vcmp.gt.f32.partialorder %v830_v46, 0.0  ;;  %v939_v49 = vmul.f32 0.2, %v830_v46 }
 0x1f2   : > { %v757_v50 = vsel %vm693_vm4, %v650_v44, %v725_v47 }
 0x1f3   : > { %879 = vmatmul.f32.gmra.mxu2 %v757_v50  ;;  %v971_v51 = vsel %vm907_vm5, %v830_v46, %v939_v49 }
 0x1f4   : > { %1059 = vmatmul.f32.gmra.mxu3 %v971_v51 }
 0x1f5   : > { %v652_v53 = vpop.f32.mrf.mxu1 }
 0x1f6   : > { %v653_v54 = vadd.f32 %v1887_v7, %v652_v53  ;;  %v832_v55 = vpop.f32.mrf.mxu2 }
 0x1f7   : > { %v833_v56 = vadd.f32 %v1924_v27, %v832_v55 }
 0x1f8   : > { %v726_v57 = vmul.f32 0.2, %v653_v54  ;;  %vm694_vm6 = vcmp.gt.f32.partialorder %v653_v54, 0.0 }
 0x1f9   : > { %vm908_vm7 = vcmp.gt.f32.partialorder %v833_v56, 0.0  ;;  %v940_v59 = vmul.f32 0.2, %v833_v56 }
 0x1fa   : > { %v758_v60 = vsel %vm694_vm6, %v653_v54, %v726_v57 }
 0x1fb   : > { %882 = vmatmul.f32.gmra.mxu2 %v758_v60  ;;  %v972_v61 = vsel %vm908_vm7, %v833_v56, %v940_v59 }
 0x1fc   : > { %1062 = vmatmul.f32.gmra.mxu3 %v972_v61 }
 0x1fd   : > { %v655_v62 = vpop.f32.mrf.mxu1 }
 0x1fe   : > { %v656_v63 = vadd.f32 %v1887_v7, %v655_v62  ;;  %v835_v0 = vpop.f32.mrf.mxu2 }
 0x1ff   : > { %v836_v1 = vadd.f32 %v1924_v27, %v835_v0 }
 0x200   : > { %v727_v4 = vmul.f32 0.2, %v656_v63  ;;  %vm695_vm8 = vcmp.gt.f32.partialorder %v656_v63, 0.0 }
 0x201   : > { %vm909_vm9 = vcmp.gt.f32.partialorder %v836_v1, 0.0  ;;  %v941_v5 = vmul.f32 0.2, %v836_v1 }
 0x202   : > { %v759_v6 = vsel %vm695_vm8, %v656_v63, %v727_v4 }
 0x203   : > { %885 = vmatmul.f32.gmra.mxu2 %v759_v6  ;;  %v973_v8 = vsel %vm909_vm9, %v836_v1, %v941_v5 }
 0x204   : > { %1065 = vmatmul.f32.gmra.mxu3 %v973_v8 }
 0x205   : > { %v658_v9 = vpop.f32.mrf.mxu1 }
 0x206   : > { %v659_v10 = vadd.f32 %v1887_v7, %v658_v9  ;;  %v838_v11 = vpop.f32.mrf.mxu2 }
 0x207   : > { %v839_v12 = vadd.f32 %v1924_v27, %v838_v11 }
 0x208   : > { %v728_v15 = vmul.f32 0.2, %v659_v10  ;;  %vm696_vm10 = vcmp.gt.f32.partialorder %v659_v10, 0.0 }
 0x209   : > { %vm910_vm11 = vcmp.gt.f32.partialorder %v839_v12, 0.0  ;;  %v942_v16 = vmul.f32 0.2, %v839_v12 }
 0x20a   : > { %v760_v17 = vsel %vm696_vm10, %v659_v10, %v728_v15 }
 0x20b   : > { %888 = vmatmul.f32.gmra.mxu2 %v760_v17  ;;  %v974_v18 = vsel %vm910_vm11, %v839_v12, %v942_v16 }
 0x20c   : > { %1068 = vmatmul.f32.gmra.mxu3 %v974_v18 }
 0x20d   : > { %v661_v20 = vpop.f32.mrf.mxu1 }
 0x20e   : > { %v662_v22 = vadd.f32 %v1887_v7, %v661_v20  ;;  %v841_v23 = vpop.f32.mrf.mxu2 }
 0x20f   : > { %v842_v24 = vadd.f32 %v1924_v27, %v841_v23 }
 0x210   : > { %v729_v25 = vmul.f32 0.2, %v662_v22  ;;  %vm697_vm12 = vcmp.gt.f32.partialorder %v662_v22, 0.0 }
 0x211   : > { %vm911_vm13 = vcmp.gt.f32.partialorder %v842_v24, 0.0  ;;  %v943_v28 = vmul.f32 0.2, %v842_v24 }
 0x212   : > { %v761_v29 = vsel %vm697_vm12, %v662_v22, %v729_v25 }
 0x213   : > { %891 = vmatmul.f32.gmra.mxu2 %v761_v29  ;;  %v975_v30 = vsel %vm911_vm13, %v842_v24, %v943_v28 }
 0x214   : > { %1071 = vmatmul.f32.gmra.mxu3 %v975_v30 }
 0x215   : > { %v664_v32 = vpop.f32.mrf.mxu1 }
 0x216   : > { %v665_v33 = vadd.f32 %v1887_v7, %v664_v32  ;;  %v844_v34 = vpop.f32.mrf.mxu2 }
 0x217   : > { %v845_v35 = vadd.f32 %v1924_v27, %v844_v34 }
 0x218   : > { %v730_v36 = vmul.f32 0.2, %v665_v33  ;;  %vm698_vm14 = vcmp.gt.f32.partialorder %v665_v33, 0.0 }
 0x219   : > { %vm912_vm15 = vcmp.gt.f32.partialorder %v845_v35, 0.0  ;;  %v944_v37 = vmul.f32 0.2, %v845_v35 }
 0x21a   : > { %v762_v39 = vsel %vm698_vm14, %v665_v33, %v730_v36 }
 0x21b   : > { %894 = vmatmul.f32.gmra.mxu2 %v762_v39  ;;  %v976_v40 = vsel %vm912_vm15, %v845_v35, %v944_v37 }
 0x21c   : > { %1074 = vmatmul.f32.gmra.mxu3 %v976_v40 }
 0x21e   : > { %v847_v41 = vpop.f32.mrf.mxu2 }
 0x21f   : > { %v848_v42 = vadd.f32 %v1924_v27, %v847_v41 }
 0x221   : > { %vm913_vm0 = vcmp.gt.f32.partialorder %v848_v42, 0.0  ;;  %v945_v43 = vmul.f32 0.2, %v848_v42 }
 0x223   : > { %v977_v44 = vsel %vm913_vm0, %v848_v42, %v945_v43 }
 0x224   : > { %1077 = vmatmul.f32.gmra.mxu3 %v977_v44 }
 0x226   : > { %v850_v45 = vpop.f32.mrf.mxu2 }
 0x227   : > { %v851_v7 = vadd.f32 %v1924_v27, %v850_v45 }
 0x229   : > { %vm914_vm1 = vcmp.gt.f32.partialorder %v851_v7, 0.0  ;;  %v946_v46 = vmul.f32 0.2, %v851_v7 }
 0x22b   : > { %v978_v47 = vsel %vm914_vm1, %v851_v7, %v946_v46 }
 0x22c   : > { %1080 = vmatmul.f32.gmra.mxu3 %v978_v47 }
 0x22e   : > { %v853_v49 = vpop.f32.mrf.mxu2 }
 0x22f   : > { %v854_v50 = vadd.f32 %v1924_v27, %v853_v49  ;;  %v1033_v51 = vpop.f32.mrf.mxu3 }
 0x230   : > { %v1034_v52 = vadd.f32 %v1961_v48, %v1033_v51 }
 0x231   : > { %vm915_vm2 = vcmp.gt.f32.partialorder %v854_v50, 0.0  ;;  %v947_v53 = vmul.f32 0.2, %v854_v50 }
 0x232   : > { %vm1129_vm3 = vcmp.gt.f32.partialorder %v1034_v52, 0.0  ;;  %v1161_v54 = vmul.f32 0.2, %v1034_v52 }
 0x233   : > { %v979_v55 = vsel %vm915_vm2, %v854_v50, %v947_v53 }
 0x234   : > { %1083 = vmatmul.f32.gmra.mxu3 %v979_v55  ;;  %v1193_v56 = vsel %vm1129_vm3, %v1034_v52, %v1161_v54 }
 0x235   : > { %1263 = vmatmul.f32.vlgmr.msrb.gmra.mxu0 %v1193_v56 }
 0x236   : > { %v856_v57 = vpop.f32.mrf.mxu2 }
 0x237   : > { %v857_v58 = vadd.f32 %v1924_v27, %v856_v57  ;;  %v1036_v59 = vpop.f32.mrf.mxu3 }
 0x238   : > { %v1037_v60 = vadd.f32 %v1961_v48, %v1036_v59 }
 0x239   : > { %vm916_vm4 = vcmp.gt.f32.partialorder %v857_v58, 0.0  ;;  %v948_v61 = vmul.f32 0.2, %v857_v58 }
 0x23a   : > { %vm1130_vm5 = vcmp.gt.f32.partialorder %v1037_v60, 0.0  ;;  %v1162_v62 = vmul.f32 0.2, %v1037_v60 }
 0x23b   : > { %v980_v63 = vsel %vm916_vm4, %v857_v58, %v948_v61 }
 0x23c   : > { %1086 = vmatmul.f32.gmra.mxu3 %v980_v63  ;;  %v1194_v0 = vsel %vm1130_vm5, %v1037_v60, %v1162_v62 }
 0x23d   : > { %1266 = vmatmul.f32.gmra.mxu0 %v1194_v0 }
 0x23e   : > { %v859_v1 = vpop.f32.mrf.mxu2 }
 0x23f   : > { %v860_v2 = vadd.f32 %v1924_v27, %v859_v1  ;;  %v1039_v3 = vpop.f32.mrf.mxu3 }
 0x240   : > { %v1040_v4 = vadd.f32 %v1961_v48, %v1039_v3 }
 0x241   : > { %v949_v5 = vmul.f32 0.2, %v860_v2  ;;  %vm917_vm6 = vcmp.gt.f32.partialorder %v860_v2, 0.0 }
 0x242   : > { %vm1131_vm7 = vcmp.gt.f32.partialorder %v1040_v4, 0.0  ;;  %v1163_v6 = vmul.f32 0.2, %v1040_v4 }
 0x243   : > { %v981_v8 = vsel %vm917_vm6, %v860_v2, %v949_v5 }
 0x244   : > { %1089 = vmatmul.f32.gmra.mxu3 %v981_v8  ;;  %v1195_v9 = vsel %vm1131_vm7, %v1040_v4, %v1163_v6 }
 0x245   : > { %1269 = vmatmul.f32.gmra.mxu0 %v1195_v9 }
 0x246   : > { %v862_v10 = vpop.f32.mrf.mxu2 }
 0x247   : > { %v863_v11 = vadd.f32 %v1924_v27, %v862_v10  ;;  %v1042_v12 = vpop.f32.mrf.mxu3 }
 0x248   : > { %v1043_v13 = vadd.f32 %v1961_v48, %v1042_v12 }
 0x249   : > { %v950_v14 = vmul.f32 0.2, %v863_v11  ;;  %vm918_vm8 = vcmp.gt.f32.partialorder %v863_v11, 0.0 }
 0x24a   : > { %vm1132_vm9 = vcmp.gt.f32.partialorder %v1043_v13, 0.0  ;;  %v1164_v15 = vmul.f32 0.2, %v1043_v13 }
 0x24b   : > { %v982_v16 = vsel %vm918_vm8, %v863_v11, %v950_v14 }
 0x24c   : > { %1092 = vmatmul.f32.gmra.mxu3 %v982_v16  ;;  %v1196_v17 = vsel %vm1132_vm9, %v1043_v13, %v1164_v15 }
 0x24d   : > { %1272 = vmatmul.f32.gmra.mxu0 %v1196_v17 }
 0x24e   : > { %v865_v18 = vpop.f32.mrf.mxu2 }
 0x24f   : > { %v866_v19 = vadd.f32 %v1924_v27, %v865_v18  ;;  %v1045_v20 = vpop.f32.mrf.mxu3 }
 0x250   : > { %v1046_v21 = vadd.f32 %v1961_v48, %v1045_v20 }
 0x251   : > { %v951_v22 = vmul.f32 0.2, %v866_v19  ;;  %vm919_vm10 = vcmp.gt.f32.partialorder %v866_v19, 0.0 }
 0x252   : > { %vm1133_vm11 = vcmp.gt.f32.partialorder %v1046_v21, 0.0  ;;  %v1165_v23 = vmul.f32 0.2, %v1046_v21 }
 0x253   : > { %v983_v24 = vsel %vm919_vm10, %v866_v19, %v951_v22 }
 0x254   : > { %1095 = vmatmul.f32.gmra.mxu3 %v983_v24  ;;  %v1197_v38 = vsel %vm1133_vm11, %v1046_v21, %v1165_v23 }
 0x255   : > { %1275 = vmatmul.f32.gmra.mxu0 %v1197_v38 }
 0x256   : > { %v868_v25 = vpop.f32.mrf.mxu2 }
 0x257   : > { %v869_v26 = vadd.f32 %v1924_v27, %v868_v25  ;;  %v1048_v28 = vpop.f32.mrf.mxu3 }
 0x258   : > { %v1049_v29 = vadd.f32 %v1961_v48, %v1048_v28 }
 0x259   : > { %v952_v30 = vmul.f32 0.2, %v869_v26  ;;  %vm920_vm12 = vcmp.gt.f32.partialorder %v869_v26, 0.0 }
 0x25a   : > { %vm1134_vm13 = vcmp.gt.f32.partialorder %v1049_v29, 0.0  ;;  %v1166_v31 = vmul.f32 0.2, %v1049_v29 }
 0x25b   : > { %v984_v32 = vsel %vm920_vm12, %v869_v26, %v952_v30 }
 0x25c   : > { %1098 = vmatmul.f32.gmra.mxu3 %v984_v32  ;;  %v1198_v33 = vsel %vm1134_vm13, %v1049_v29, %v1166_v31 }
 0x25d   : > { %1278 = vmatmul.f32.gmra.mxu0 %v1198_v33 }
 0x25e   : > { %v871_v34 = vpop.f32.mrf.mxu2 }
 0x25f   : > { %v872_v35 = vadd.f32 %v1924_v27, %v871_v34  ;;  %v1051_v36 = vpop.f32.mrf.mxu3 }
 0x260   : > { %v1052_v37 = vadd.f32 %v1961_v48, %v1051_v36 }
 0x261   : > { %v953_v39 = vmul.f32 0.2, %v872_v35  ;;  %vm921_vm14 = vcmp.gt.f32.partialorder %v872_v35, 0.0 }
 0x262   : > { %vm1135_vm15 = vcmp.gt.f32.partialorder %v1052_v37, 0.0  ;;  %v1167_v40 = vmul.f32 0.2, %v1052_v37 }
 0x263   : > { %v985_v41 = vsel %vm921_vm14, %v872_v35, %v953_v39 }
 0x264   : > { %1101 = vmatmul.f32.gmra.mxu3 %v985_v41  ;;  %v1199_v42 = vsel %vm1135_vm15, %v1052_v37, %v1167_v40 }
 0x265   : > { %1281 = vmatmul.f32.gmra.mxu0 %v1199_v42 }
 0x266   : > { %v874_v43 = vpop.f32.mrf.mxu2 }
 0x267   : > { %v875_v44 = vadd.f32 %v1924_v27, %v874_v43  ;;  %v1054_v45 = vpop.f32.mrf.mxu3 }
 0x268   : > { %v1055_v7 = vadd.f32 %v1961_v48, %v1054_v45 }
 0x269   : > { %v954_v46 = vmul.f32 0.2, %v875_v44  ;;  %vm922_vm0 = vcmp.gt.f32.partialorder %v875_v44, 0.0 }
 0x26a   : > { %vm1136_vm1 = vcmp.gt.f32.partialorder %v1055_v7, 0.0  ;;  %v1168_v47 = vmul.f32 0.2, %v1055_v7 }
 0x26b   : > { %v986_v49 = vsel %vm922_vm0, %v875_v44, %v954_v46 }
 0x26c   : > { %1104 = vmatmul.f32.gmra.mxu3 %v986_v49  ;;  %v1200_v50 = vsel %vm1136_vm1, %v1055_v7, %v1168_v47  ;;  %v2000_v49 = vld [vmem:[%s2120_s2 + $0x4] ss:$0 sm:$0xff] }
 0x26d   : > { %1284 = vmatmul.f32.gmra.mxu0 %v1200_v50 }
 0x26e   : > { %v877_v51 = vpop.f32.mrf.mxu2 }
 0x26f   : > { %v878_v52 = vadd.f32 %v1924_v27, %v877_v51  ;;  %v1057_v53 = vpop.f32.mrf.mxu3 }
 0x270   : > { %v1058_v54 = vadd.f32 %v1961_v48, %v1057_v53 }
 0x271   : > { %v955_v55 = vmul.f32 0.2, %v878_v52  ;;  %vm923_vm2 = vcmp.gt.f32.partialorder %v878_v52, 0.0 }
 0x272   : > { %vm1137_vm3 = vcmp.gt.f32.partialorder %v1058_v54, 0.0  ;;  %v1169_v56 = vmul.f32 0.2, %v1058_v54 }
 0x273   : > { %v987_v57 = vsel %vm923_vm2, %v878_v52, %v955_v55 }
 0x274   : > { %1107 = vmatmul.f32.gmra.mxu3 %v987_v57  ;;  %v1201_v58 = vsel %vm1137_vm3, %v1058_v54, %v1169_v56 }
 0x275   : > { %1287 = vmatmul.f32.gmra.mxu0 %v1201_v58 }
 0x276   : > { %v880_v59 = vpop.f32.mrf.mxu2 }
 0x277   : > { %v881_v60 = vadd.f32 %v1924_v27, %v880_v59  ;;  %v1060_v61 = vpop.f32.mrf.mxu3 }
 0x278   : > { %v1061_v62 = vadd.f32 %v1961_v48, %v1060_v61 }
 0x279   : > { %v956_v63 = vmul.f32 0.2, %v881_v60  ;;  %vm924_vm4 = vcmp.gt.f32.partialorder %v881_v60, 0.0 }
 0x27a   : > { %vm1138_vm5 = vcmp.gt.f32.partialorder %v1061_v62, 0.0  ;;  %v1170_v0 = vmul.f32 0.2, %v1061_v62 }
 0x27b   : > { %v988_v1 = vsel %vm924_vm4, %v881_v60, %v956_v63 }
 0x27c   : > { %1110 = vmatmul.f32.gmra.mxu3 %v988_v1  ;;  %v1202_v2 = vsel %vm1138_vm5, %v1061_v62, %v1170_v0 }
 0x27d   : > { %1290 = vmatmul.f32.gmra.mxu0 %v1202_v2 }
 0x27e   : > { %v883_v3 = vpop.f32.mrf.mxu2 }
 0x27f   : > { %v884_v4 = vadd.f32 %v1924_v27, %v883_v3  ;;  %v1063_v5 = vpop.f32.mrf.mxu3 }
 0x280   : > { %v1064_v6 = vadd.f32 %v1961_v48, %v1063_v5 }
 0x281   : > { %v957_v8 = vmul.f32 0.2, %v884_v4  ;;  %vm925_vm6 = vcmp.gt.f32.partialorder %v884_v4, 0.0 }
 0x282   : > { %vm1139_vm7 = vcmp.gt.f32.partialorder %v1064_v6, 0.0  ;;  %v1171_v9 = vmul.f32 0.2, %v1064_v6 }
 0x283   : > { %v989_v10 = vsel %vm925_vm6, %v884_v4, %v957_v8 }
 0x284   : > { %1113 = vmatmul.f32.gmra.mxu3 %v989_v10  ;;  %v1203_v11 = vsel %vm1139_vm7, %v1064_v6, %v1171_v9 }
 0x285   : > { %1293 = vmatmul.f32.gmra.mxu0 %v1203_v11 }
 0x286   : > { %v886_v12 = vpop.f32.mrf.mxu2 }
 0x287   : > { %v887_v13 = vadd.f32 %v1924_v27, %v886_v12  ;;  %v1066_v14 = vpop.f32.mrf.mxu3 }
 0x288   : > { %v1067_v15 = vadd.f32 %v1961_v48, %v1066_v14 }
 0x289   : > { %v958_v16 = vmul.f32 0.2, %v887_v13  ;;  %vm926_vm8 = vcmp.gt.f32.partialorder %v887_v13, 0.0 }
 0x28a   : > { %vm1140_vm9 = vcmp.gt.f32.partialorder %v1067_v15, 0.0  ;;  %v1172_v17 = vmul.f32 0.2, %v1067_v15 }
 0x28b   : > { %v990_v18 = vsel %vm926_vm8, %v887_v13, %v958_v16 }
 0x28c   : > { %1116 = vmatmul.f32.gmra.mxu3 %v990_v18  ;;  %v1204_v19 = vsel %vm1140_vm9, %v1067_v15, %v1172_v17 }
 0x28d   : > { %1296 = vmatmul.f32.gmra.mxu0 %v1204_v19 }
 0x28e   : > { %v889_v20 = vpop.f32.mrf.mxu2 }
 0x28f   : > { %v890_v21 = vadd.f32 %v1924_v27, %v889_v20  ;;  %v1069_v22 = vpop.f32.mrf.mxu3 }
 0x290   : > { %v1070_v23 = vadd.f32 %v1961_v48, %v1069_v22 }
 0x291   : > { %v959_v24 = vmul.f32 0.2, %v890_v21  ;;  %vm927_vm10 = vcmp.gt.f32.partialorder %v890_v21, 0.0 }
 0x292   : > { %vm1141_vm11 = vcmp.gt.f32.partialorder %v1070_v23, 0.0  ;;  %v1173_v38 = vmul.f32 0.2, %v1070_v23 }
 0x293   : > { %v991_v25 = vsel %vm927_vm10, %v890_v21, %v959_v24 }
 0x294   : > { %1119 = vmatmul.f32.gmra.mxu3 %v991_v25  ;;  %v1205_v26 = vsel %vm1141_vm11, %v1070_v23, %v1173_v38 }
 0x295   : > { %1299 = vmatmul.f32.gmra.mxu0 %v1205_v26 }
 0x296   : > { %v892_v28 = vpop.f32.mrf.mxu2 }
 0x297   : > { %v893_v29 = vadd.f32 %v1924_v27, %v892_v28  ;;  %v1072_v30 = vpop.f32.mrf.mxu3 }
 0x298   : > { %v1073_v31 = vadd.f32 %v1961_v48, %v1072_v30 }
 0x299   : > { %v960_v32 = vmul.f32 0.2, %v893_v29  ;;  %vm928_vm12 = vcmp.gt.f32.partialorder %v893_v29, 0.0 }
 0x29a   : > { %vm1142_vm13 = vcmp.gt.f32.partialorder %v1073_v31, 0.0  ;;  %v1174_v33 = vmul.f32 0.2, %v1073_v31 }
 0x29b   : > { %v992_v34 = vsel %vm928_vm12, %v893_v29, %v960_v32 }
 0x29c   : > { %1122 = vmatmul.f32.gmra.mxu3 %v992_v34  ;;  %v1206_v35 = vsel %vm1142_vm13, %v1073_v31, %v1174_v33 }
 0x29d   : > { %1302 = vmatmul.f32.gmra.mxu0 %v1206_v35 }
 0x29e   : > { %v895_v36 = vpop.f32.mrf.mxu2 }
 0x29f   : > { %v896_v37 = vadd.f32 %v1924_v27, %v895_v36  ;;  %v1075_v39 = vpop.f32.mrf.mxu3 }
 0x2a0   : > { %v1076_v40 = vadd.f32 %v1961_v48, %v1075_v39 }
 0x2a1   : > { %v961_v41 = vmul.f32 0.2, %v896_v37  ;;  %vm929_vm14 = vcmp.gt.f32.partialorder %v896_v37, 0.0 }
 0x2a2   : > { %v1175_v42 = vmul.f32 0.2, %v1076_v40  ;;  %vm1143_vm15 = vcmp.gt.f32.partialorder %v1076_v40, 0.0 }
 0x2a3   : > { %v993_v43 = vsel %vm929_vm14, %v896_v37, %v961_v41 }
 0x2a4   : > { %1125 = vmatmul.f32.gmra.mxu3 %v993_v43  ;;  %v1207_v44 = vsel %vm1143_vm15, %v1076_v40, %v1175_v42 }
 0x2a5   : > { %1305 = vmatmul.f32.gmra.mxu0 %v1207_v44 }
 0x2a7   : > { %v1078_v45 = vpop.f32.mrf.mxu3 }
 0x2a8   : > { %v1079_v7 = vadd.f32 %v1961_v48, %v1078_v45 }
 0x2aa   : > { %v1176_v46 = vmul.f32 0.2, %v1079_v7  ;;  %vm1144_vm0 = vcmp.gt.f32.partialorder %v1079_v7, 0.0 }
 0x2ac   : > { %v1208_v47 = vsel %vm1144_vm0, %v1079_v7, %v1176_v46 }
 0x2ad   : > { %1308 = vmatmul.f32.gmra.mxu0 %v1208_v47 }
 0x2af   : > { %v1081_v27 = vpop.f32.mrf.mxu3 }
 0x2b0   : > { %v1082_v50 = vadd.f32 %v1961_v48, %v1081_v27 }
 0x2b2   : > { %v1177_v51 = vmul.f32 0.2, %v1082_v50  ;;  %v1264_v52 = vpop.f32.mrf.mxu0  ;;  %vm1145_vm1 = vcmp.gt.f32.partialorder %v1082_v50, 0.0 }
 0x2b3   : > { %v1265_v53 = vadd.f32 %v2000_v49, %v1264_v52 }
 0x2b4   : > { %v1209_v54 = vsel %vm1145_vm1, %v1082_v50, %v1177_v51 }
 0x2b5   : > { %1360 = vst [vmem:[%s2004_s30] sm:$0xff] %v1265_v53  ;;  %1311 = vmatmul.f32.gmra.mxu0 %v1209_v54 }
 0x2b7   : > { %v1084_v55 = vpop.f32.mrf.mxu3 }
 0x2b8   : > { %v1085_v56 = vadd.f32 %v1961_v48, %v1084_v55 }
 0x2ba   : > { %v1178_v57 = vmul.f32 0.2, %v1085_v56  ;;  %v1267_v58 = vpop.f32.mrf.mxu0  ;;  %vm1146_vm2 = vcmp.gt.f32.partialorder %v1085_v56, 0.0 }
 0x2bb   : > { %v1268_v59 = vadd.f32 %v2000_v49, %v1267_v58 }
 0x2bc   : > { %v1210_v60 = vsel %vm1146_vm2, %v1085_v56, %v1178_v57 }
 0x2bd   : > { %1361 = vst [vmem:[%s2004_s30 + $0x8] sm:$0xff] %v1268_v59  ;;  %1314 = vmatmul.f32.gmra.mxu0 %v1210_v60 }
 0x2bf   : > { %v1087_v61 = vpop.f32.mrf.mxu3 }
 0x2c0   : > { %v1088_v62 = vadd.f32 %v1961_v48, %v1087_v61 }
 0x2c2   : > { %v1179_v63 = vmul.f32 0.2, %v1088_v62  ;;  %v1270_v0 = vpop.f32.mrf.mxu0  ;;  %vm1147_vm3 = vcmp.gt.f32.partialorder %v1088_v62, 0.0 }
 0x2c3   : > { %v1271_v1 = vadd.f32 %v2000_v49, %v1270_v0 }
 0x2c4   : > { %v1211_v2 = vsel %vm1147_vm3, %v1088_v62, %v1179_v63 }
 0x2c5   : > { %1362 = vst [vmem:[%s2004_s30 + $0x10] sm:$0xff] %v1271_v1  ;;  %1317 = vmatmul.f32.gmra.mxu0 %v1211_v2 }
 0x2c7   : > { %v1090_v3 = vpop.f32.mrf.mxu3 }
 0x2c8   : > { %v1091_v4 = vadd.f32 %v1961_v48, %v1090_v3 }
 0x2ca   : > { %v1180_v5 = vmul.f32 0.2, %v1091_v4  ;;  %v1273_v6 = vpop.f32.mrf.mxu0  ;;  %vm1148_vm4 = vcmp.gt.f32.partialorder %v1091_v4, 0.0 }
 0x2cb   : > { %v1274_v8 = vadd.f32 %v2000_v49, %v1273_v6 }
 0x2cc   : > { %v1212_v9 = vsel %vm1148_vm4, %v1091_v4, %v1180_v5 }
 0x2cd   : > { %1363 = vst [vmem:[%s2004_s30 + $0x18] sm:$0xff] %v1274_v8  ;;  %1320 = vmatmul.f32.gmra.mxu0 %v1212_v9 }
 0x2cf   : > { %v1093_v10 = vpop.f32.mrf.mxu3 }
 0x2d0   : > { %v1094_v11 = vadd.f32 %v1961_v48, %v1093_v10 }
 0x2d2   : > { %v1181_v12 = vmul.f32 0.2, %v1094_v11  ;;  %v1276_v13 = vpop.f32.mrf.mxu0  ;;  %vm1149_vm5 = vcmp.gt.f32.partialorder %v1094_v11, 0.0 }
 0x2d3   : > { %v1277_v14 = vadd.f32 %v2000_v49, %v1276_v13 }
 0x2d4   : > { %v1213_v15 = vsel %vm1149_vm5, %v1094_v11, %v1181_v12 }
 0x2d5   : > { %1364 = vst [vmem:[%s2004_s30 + $0x20] sm:$0xff] %v1277_v14  ;;  %1323 = vmatmul.f32.gmra.mxu0 %v1213_v15 }
 0x2d7   : > { %v1096_v16 = vpop.f32.mrf.mxu3 }
 0x2d8   : > { %v1097_v17 = vadd.f32 %v1961_v48, %v1096_v16 }
 0x2da   : > { %v1182_v18 = vmul.f32 0.2, %v1097_v17  ;;  %v1279_v19 = vpop.f32.mrf.mxu0  ;;  %vm1150_vm6 = vcmp.gt.f32.partialorder %v1097_v17, 0.0 }
 0x2db   : > { %v1280_v20 = vadd.f32 %v2000_v49, %v1279_v19 }
 0x2dc   : > { %v1214_v21 = vsel %vm1150_vm6, %v1097_v17, %v1182_v18 }
 0x2dd   : > { %1365 = vst [vmem:[%s2004_s30 + $0x28] sm:$0xff] %v1280_v20  ;;  %1326 = vmatmul.f32.gmra.mxu0 %v1214_v21 }
 0x2df   : > { %v1099_v22 = vpop.f32.mrf.mxu3 }
 0x2e0   : > { %v1100_v23 = vadd.f32 %v1961_v48, %v1099_v22 }
 0x2e2   : > { %v1183_v24 = vmul.f32 0.2, %v1100_v23  ;;  %v1282_v38 = vpop.f32.mrf.mxu0  ;;  %vm1151_vm7 = vcmp.gt.f32.partialorder %v1100_v23, 0.0 }
 0x2e3   : > { %v1283_v25 = vadd.f32 %v2000_v49, %v1282_v38 }
 0x2e4   : > { %v1215_v26 = vsel %vm1151_vm7, %v1100_v23, %v1183_v24 }
 0x2e5   : > { %1366 = vst [vmem:[%s2004_s30 + $0x30] sm:$0xff] %v1283_v25  ;;  %1329 = vmatmul.f32.gmra.mxu0 %v1215_v26 }
 0x2e7   : > { %v1102_v28 = vpop.f32.mrf.mxu3 }
 0x2e8   : > { %v1103_v29 = vadd.f32 %v1961_v48, %v1102_v28 }
 0x2ea   : > { %v1184_v30 = vmul.f32 0.2, %v1103_v29  ;;  %v1285_v31 = vpop.f32.mrf.mxu0  ;;  %vm1152_vm8 = vcmp.gt.f32.partialorder %v1103_v29, 0.0 }
 0x2eb   : > { %v1286_v32 = vadd.f32 %v2000_v49, %v1285_v31 }
 0x2ec   : > { %v1216_v33 = vsel %vm1152_vm8, %v1103_v29, %v1184_v30 }
 0x2ed   : > { %1367 = vst [vmem:[%s2004_s30 + $0x38] sm:$0xff] %v1286_v32  ;;  %1332 = vmatmul.f32.gmra.mxu0 %v1216_v33 }
 0x2ef   : > { %v1105_v34 = vpop.f32.mrf.mxu3 }
 0x2f0   : > { %v1106_v35 = vadd.f32 %v1961_v48, %v1105_v34 }
 0x2f2   : > { %v1185_v36 = vmul.f32 0.2, %v1106_v35  ;;  %v1288_v37 = vpop.f32.mrf.mxu0  ;;  %vm1153_vm9 = vcmp.gt.f32.partialorder %v1106_v35, 0.0 }
 0x2f3   : > { %v1289_v39 = vadd.f32 %v2000_v49, %v1288_v37 }
 0x2f4   : > { %v1217_v40 = vsel %vm1153_vm9, %v1106_v35, %v1185_v36 }
 0x2f5   : > { %1368 = vst [vmem:[%s2004_s30 + $0x40] sm:$0xff] %v1289_v39  ;;  %1335 = vmatmul.f32.gmra.mxu0 %v1217_v40 }
 0x2f7   : > { %v1108_v41 = vpop.f32.mrf.mxu3 }
 0x2f8   : > { %v1109_v42 = vadd.f32 %v1961_v48, %v1108_v41 }
 0x2fa   : > { %v1186_v43 = vmul.f32 0.2, %v1109_v42  ;;  %v1291_v44 = vpop.f32.mrf.mxu0  ;;  %vm1154_vm10 = vcmp.gt.f32.partialorder %v1109_v42, 0.0 }
 0x2fb   : > { %v1292_v45 = vadd.f32 %v2000_v49, %v1291_v44 }
 0x2fc   : > { %v1218_v7 = vsel %vm1154_vm10, %v1109_v42, %v1186_v43 }
 0x2fd   : > { %1369 = vst [vmem:[%s2004_s30 + $0x48] sm:$0xff] %v1292_v45  ;;  %1338 = vmatmul.f32.gmra.mxu0 %v1218_v7 }
 0x2ff   : > { %v1111_v46 = vpop.f32.mrf.mxu3 }
 0x300   : > { %v1112_v47 = vadd.f32 %v1961_v48, %v1111_v46 }
 0x302   : > { %v1187_v27 = vmul.f32 0.2, %v1112_v47  ;;  %v1294_v50 = vpop.f32.mrf.mxu0  ;;  %vm1155_vm11 = vcmp.gt.f32.partialorder %v1112_v47, 0.0 }
 0x303   : > { %v1295_v51 = vadd.f32 %v2000_v49, %v1294_v50 }
 0x304   : > { %v1219_v52 = vsel %vm1155_vm11, %v1112_v47, %v1187_v27 }
 0x305   : > { %1370 = vst [vmem:[%s2004_s30 + $0x50] sm:$0xff] %v1295_v51  ;;  %1341 = vmatmul.f32.gmra.mxu0 %v1219_v52 }
 0x307   : > { %v1114_v53 = vpop.f32.mrf.mxu3 }
 0x308   : > { %v1115_v54 = vadd.f32 %v1961_v48, %v1114_v53 }
 0x30a   : > { %v1188_v55 = vmul.f32 0.2, %v1115_v54  ;;  %v1297_v56 = vpop.f32.mrf.mxu0  ;;  %vm1156_vm12 = vcmp.gt.f32.partialorder %v1115_v54, 0.0 }
 0x30b   : > { %v1298_v57 = vadd.f32 %v2000_v49, %v1297_v56 }
 0x30c   : > { %v1220_v58 = vsel %vm1156_vm12, %v1115_v54, %v1188_v55 }
 0x30d   : > { %1371 = vst [vmem:[%s2004_s30 + $0x58] sm:$0xff] %v1298_v57  ;;  %1344 = vmatmul.f32.gmra.mxu0 %v1220_v58 }
 0x30f   : > { %v1117_v59 = vpop.f32.mrf.mxu3 }
 0x310   : > { %v1118_v60 = vadd.f32 %v1961_v48, %v1117_v59 }
 0x312   : > { %v1189_v61 = vmul.f32 0.2, %v1118_v60  ;;  %v1300_v62 = vpop.f32.mrf.mxu0  ;;  %vm1157_vm13 = vcmp.gt.f32.partialorder %v1118_v60, 0.0 }
 0x313   : > { %v1301_v63 = vadd.f32 %v2000_v49, %v1300_v62 }
 0x314   : > { %v1221_v0 = vsel %vm1157_vm13, %v1118_v60, %v1189_v61 }
 0x315   : > { %1372 = vst [vmem:[%s2004_s30 + $0x60] sm:$0xff] %v1301_v63  ;;  %1347 = vmatmul.f32.gmra.mxu0 %v1221_v0 }
 0x317   : > { %v1120_v1 = vpop.f32.mrf.mxu3 }
 0x318   : > { %v1121_v2 = vadd.f32 %v1961_v48, %v1120_v1 }
 0x31a   : > { %v1190_v3 = vmul.f32 0.2, %v1121_v2  ;;  %v1303_v4 = vpop.f32.mrf.mxu0  ;;  %vm1158_vm14 = vcmp.gt.f32.partialorder %v1121_v2, 0.0 }
 0x31b   : > { %v1304_v5 = vadd.f32 %v2000_v49, %v1303_v4 }
 0x31c   : > { %v1222_v6 = vsel %vm1158_vm14, %v1121_v2, %v1190_v3 }
 0x31d   : > { %1373 = vst [vmem:[%s2004_s30 + $0x68] sm:$0xff] %v1304_v5  ;;  %1350 = vmatmul.f32.gmra.mxu0 %v1222_v6 }
 0x31f   : > { %v1123_v8 = vpop.f32.mrf.mxu3 }
 0x320   : > { %v1124_v9 = vadd.f32 %v1961_v48, %v1123_v8 }
 0x322   : > { %vm1159_vm15 = vcmp.gt.f32.partialorder %v1124_v9, 0.0  ;;  %v1191_v10 = vmul.f32 0.2, %v1124_v9  ;;  %v1306_v11 = vpop.f32.mrf.mxu0 }
 0x323   : > { %v1307_v12 = vadd.f32 %v2000_v49, %v1306_v11 }
 0x324   : > { %v1223_v13 = vsel %vm1159_vm15, %v1124_v9, %v1191_v10 }
 0x325   : > { %1374 = vst [vmem:[%s2004_s30 + $0x70] sm:$0xff] %v1307_v12  ;;  %1353 = vmatmul.f32.vlgmr.msra.gmra.mxu3 %v1223_v13 }
 0x327   : > { %v1126_v14 = vpop.f32.mrf.mxu3 }
 0x328   : > { %v1127_v15 = vadd.f32 %v1961_v48, %v1126_v14 }
 0x32a   : > { %v1192_v16 = vmul.f32 0.2, %v1127_v15  ;;  %v1309_v17 = vpop.f32.mrf.mxu0  ;;  %vm1160_vm0 = vcmp.gt.f32.partialorder %v1127_v15, 0.0 }
 0x32b   : > { %v1310_v18 = vadd.f32 %v2000_v49, %v1309_v17 }
 0x32c   : > { %v1224_v19 = vsel %vm1160_vm0, %v1127_v15, %v1192_v16 }
 0x32d   : > { %1375 = vst [vmem:[%s2004_s30 + $0x78] sm:$0xff] %v1310_v18  ;;  %1356 = vmatmul.f32.gmra.mxu3 %v1224_v19 }
 0x332   : > { %v1312_v20 = vpop.f32.mrf.mxu0 }
 0x333   : > { %v1313_v21 = vadd.f32 %v2000_v49, %v1312_v20 }
 0x335   : > { %1376 = vst [vmem:[%s2004_s30 + $0x80] sm:$0xff] %v1313_v21 }
 0x33a   : > { %v1315_v22 = vpop.f32.mrf.mxu0 }
 0x33b   : > { %v1316_v23 = vadd.f32 %v2000_v49, %v1315_v22 }
 0x33d   : > { %1377 = vst [vmem:[%s2004_s30 + $0x88] sm:$0xff] %v1316_v23 }
 0x342   : > { %v1318_v48 = vpop.f32.mrf.mxu0 }
 0x343   : > { %v1319_v24 = vadd.f32 %v2000_v49, %v1318_v48 }
 0x345   : > { %1378 = vst [vmem:[%s2004_s30 + $0x90] sm:$0xff] %v1319_v24 }
 0x34a   : > { %v1321_v38 = vpop.f32.mrf.mxu0 }
 0x34b   : > { %v1322_v25 = vadd.f32 %v2000_v49, %v1321_v38 }
 0x34d   : > { %1379 = vst [vmem:[%s2004_s30 + $0x98] sm:$0xff] %v1322_v25 }
 0x352   : > { %v1324_v26 = vpop.f32.mrf.mxu0 }
 0x353   : > { %v1325_v28 = vadd.f32 %v2000_v49, %v1324_v26 }
 0x355   : > { %1380 = vst [vmem:[%s2004_s30 + $0xa0] sm:$0xff] %v1325_v28 }
 0x35a   : > { %v1327_v29 = vpop.f32.mrf.mxu0 }
 0x35b   : > { %v1328_v30 = vadd.f32 %v2000_v49, %v1327_v29 }
 0x35d   : > { %1381 = vst [vmem:[%s2004_s30 + $0xa8] sm:$0xff] %v1328_v30 }
 0x362   : > { %v1330_v31 = vpop.f32.mrf.mxu0 }
 0x363   : > { %v1331_v32 = vadd.f32 %v2000_v49, %v1330_v31 }
 0x365   : > { %1382 = vst [vmem:[%s2004_s30 + $0xb0] sm:$0xff] %v1331_v32 }
 0x36a   : > { %v1333_v33 = vpop.f32.mrf.mxu0 }
 0x36b   : > { %v1334_v34 = vadd.f32 %v2000_v49, %v1333_v33 }
 0x36d   : > { %1383 = vst [vmem:[%s2004_s30 + $0xb8] sm:$0xff] %v1334_v34 }
 0x372   : > { %v1336_v35 = vpop.f32.mrf.mxu0 }
 0x373   : > { %v1337_v36 = vadd.f32 %v2000_v49, %v1336_v35 }
 0x375   : > { %1384 = vst [vmem:[%s2004_s30 + $0xc0] sm:$0xff] %v1337_v36 }
 0x37a   : > { %v1339_v37 = vpop.f32.mrf.mxu0 }
 0x37b   : > { %v1340_v39 = vadd.f32 %v2000_v49, %v1339_v37 }
 0x37d   : > { %1385 = vst [vmem:[%s2004_s30 + $0xc8] sm:$0xff] %v1340_v39 }
 0x382   : > { %v1342_v40 = vpop.f32.mrf.mxu0 }
 0x383   : > { %v1343_v41 = vadd.f32 %v2000_v49, %v1342_v40 }
 0x385   : > { %1386 = vst [vmem:[%s2004_s30 + $0xd0] sm:$0xff] %v1343_v41 }
 0x38a   : > { %v1345_v42 = vpop.f32.mrf.mxu0 }
 0x38b   : > { %v1346_v43 = vadd.f32 %v2000_v49, %v1345_v42 }
 0x38d   : > { %1387 = vst [vmem:[%s2004_s30 + $0xd8] sm:$0xff] %v1346_v43 }
 0x392   : > { %v1348_v44 = vpop.f32.mrf.mxu0 }
 0x393   : > { %v1349_v45 = vadd.f32 %v2000_v49, %v1348_v44 }
 0x395   : > { %1388 = vst [vmem:[%s2004_s30 + $0xe0] sm:$0xff] %v1349_v45 }
 0x39a   : > { %v1351_v7 = vpop.f32.mrf.mxu0 }
 0x39b   : > { %v1352_v46 = vadd.f32 %v2000_v49, %v1351_v7 }
 0x39d   : > { %1389 = vst [vmem:[%s2004_s30 + $0xe8] sm:$0xff] %v1352_v46 }
 0x3a8   : > { %v1354_v47 = vpop.f32.mrf.mxu3 }
 0x3a9   : > { %v1355_v27 = vadd.f32 %v2000_v49, %v1354_v47 }
 0x3ab   : > { %1390 = vst [vmem:[%s2004_s30 + $0xf0] sm:$0xff] %v1355_v27 }
 0x3b0   : > { %v1357_v50 = vpop.f32.mrf.mxu3 }
 0x3b1   : > { %v1358_v51 = vadd.f32 %v2000_v49, %v1357_v50 }
 0x3b3   : > { %1391 = vst [vmem:[%s2004_s30 + $0xf8] sm:$0xff] %v1358_v51 }
 0x3b4   : > { %1668 = shalt.err (!%p1665_p8)
}
 0x3b5   : > { %s1712_s26 = smov 128   ;;  %s1713_s27 = smov 8  }
 0x3b6   : > { %1556 = dma.vmem_to_hbm [thread:$0]  (%p1772_p5), %s1406_s8, 4096, %s1408_s9, %s1393_s10, %s1712_s26, %s1712_s26, %s1713_s27  }
 0x3b7 PF: > { %p1568_p9 = scmp.ge.s32.totalorder %s1707_s15, 2  ;;  %s1422_s28 = sand.u32 1, %s1695_s12  }
 0x3b8   : > { %s1423_s29 = scalar_lea.sflag [#allocation4], %s1422_s28 }
 0x3b9   : > { %p1563_p10 = pnand %p1568_p9, %p1776_p6 }
 0x3bb   : > { %p1564_p11 = pneg %p1563_p10 }
 0x3bd   : > { %1690 = dma.done.wait (%p1564_p11), %s1423_s29, 4096  }
 0x3be   : > { %1692 = vsyncadd (%p1564_p11), %s1423_s29, 4294963200  ;;  %p14_p12 = scmp.ge.s32.totalorder %s1759_s18, 4   ;;  %s2124_s12 = smov %s1699_s13 }
 0x3bf   : > { %s2125_s13 = smov %s1703_s14  ;;  %s2126_s14 = smov %s1770_s21 }
 0x3c0   : > { %s2127_s15 = smov %s1759_s18  ;;  %16 = sbr.rel (!%p14_p12) target bundleno = 4 (0x4), region = 80 }
 0x3c5   :  { %1429 = vsyncpa [#allocation3], 1 }
 0x3c6   :  { %1431 = vsyncpa [#allocation3 + $0x1], 1 }
 0x3c7   :  { %1432 = vsyncpa [#allocation4], 1 }
 0x3c8   :  { %1434 = vsyncpa [#allocation4 + $0x1], 1 }

</bundles_post_ra>
